<compile_context>
chip_gen: v5e
topology: v5e:2x2
jax: 0.10.0
libtpu: 0.0.40
codegen_flags: <defaults>
</compile_context>

<pallas_src>
import jax
import jax.numpy as jnp
from jax.experimental import pallas as pl
from jax.experimental.pallas import tpu as pltpu

# --- small, TPU-aligned config consistent with the module structure ---
# (reference: n_vocab=49408, n_embed=768, n_token=77, 12 layers, 12 heads)
N_VOCAB = 512
N_TOKEN = 16
N_EMBED = 128
N_HEAD = 4
N_LAYERS = 3
BATCH = 2
D_HEAD = N_EMBED // N_HEAD
EPS = 1e-5                       # PyTorch LayerNorm default
PARAM_DTYPE = jnp.bfloat16       # weights / activations in HBM & VMEM I/O


def _layernorm(x, w, b):
    """f32 LayerNorm over the last axis; w/b broadcast as (1, D)."""
    mu = jnp.mean(x, axis=-1, keepdims=True)
    var = jnp.mean((x - mu) ** 2, axis=-1, keepdims=True)
    return (x - mu) * jax.lax.rsqrt(var + EPS) * w + b


# ---------------------------------------------------------------------------
# Fused Pallas kernel: all CLIP layers + final LayerNorm for one batch element.
# grid = (B, N_LAYERS); the running activation persists in x_sc across layers.
# ---------------------------------------------------------------------------
def clip_fused_kernel(x_ref, lnw_ref, lnb_ref,
                      wqkv_ref, bqkv_ref, wo_ref, bo_ref,
                      w1_ref, b1_ref, w2_ref, b2_ref,
                      flnw_ref, flnb_ref,
                      o_ref, x_sc):
    layer = pl.program_id(1)

    @pl.when(layer == 0)
    def _():
        x_sc[...] = x_ref[0].astype(jnp.float32)

    x = x_sc[...]                                  # (T, D) f32
    lnw = lnw_ref[0].astype(jnp.float32)           # (1, D)
    lnb = lnb_ref[0].astype(jnp.float32)           # (1, D)

    # --- attention sub-block (pre-LN) ---
    # TODO(synk): no causal mask, matching the reference forward as written;
    # real CLIP text encoders use causal self-attention.
    residue = x
    h = _layernorm(x, lnw, lnb)
    qkv = (jnp.dot(h.astype(PARAM_DTYPE), wqkv_ref[0],
                   preferred_element_type=jnp.float32)
           + bqkv_ref[0].astype(jnp.float32))      # (T, 3D) f32
    q = qkv[:, :N_EMBED]
    k = qkv[:, N_EMBED:2 * N_EMBED]
    v = qkv[:, 2 * N_EMBED:]

    wo = wo_ref[0]                                 # (D, D) bf16
    scale = 1.0 / (D_HEAD ** 0.5)
    attn = bo_ref[0].astype(jnp.float32)           # (1, D) -> broadcasts over T
    for hh in range(N_HEAD):                       # static head loop
        lo = hh * D_HEAD
        qh = q[:, lo:lo + D_HEAD].astype(PARAM_DTYPE)
        kh = k[:, lo:lo + D_HEAD].astype(PARAM_DTYPE)
        vh = v[:, lo:lo + D_HEAD].astype(PARAM_DTYPE)
        s = jnp.dot(qh, kh.T, preferred_element_type=jnp.float32) * scale
        s = s - jnp.max(s, axis=-1, keepdims=True)
        p = jnp.exp(s)
        p = p * pl.reciprocal(jnp.sum(p, axis=-1, keepdims=True), approx=True)
        oh = jnp.dot(p.astype(PARAM_DTYPE), vh,
                     preferred_element_type=jnp.float32)           # (T, Dh)
        # fold the lane-axis concat into the output projection:
        attn = attn + jnp.dot(oh.astype(PARAM_DTYPE), wo[lo:lo + D_HEAD, :],
                              preferred_element_type=jnp.float32)  # (T, D)
    x = attn + residue

    # --- MLP sub-block ---
    # NOTE: the reference CLIPLayer re-uses the *same* LayerNorm params twice;
    # we match that (shared lnw/lnb for both sub-blocks).
    residue = x
    h = _layernorm(x, lnw, lnb)
    h = (jnp.dot(h.astype(PARAM_DTYPE), w1_ref[0],
                 preferred_element_type=jnp.float32)
         + b1_ref[0].astype(jnp.float32))
    h = h * jax.nn.sigmoid(1.702 * h)              # quick-GELU
    # TODO(synk): reference forward omits linear_2 (residual add would be
    # shape-invalid as written); standard CLIP applies it, so we do too.
    h = (jnp.dot(h.astype(PARAM_DTYPE), w2_ref[0],
                 preferred_element_type=jnp.float32)
         + b2_ref[0].astype(jnp.float32))
    x = h + residue
    x_sc[...] = x

    # --- final LayerNorm + write-back on the last layer only ---
    @pl.when(layer == pl.num_programs(1) - 1)
    def _():
        y = _layernorm(x,
                       flnw_ref[...].astype(jnp.float32),
                       flnb_ref[...].astype(jnp.float32))
        o_ref[0] = y.astype(o_ref.dtype)


def clip_fused(x, params):
    B, T, D = x.shape
    L = params["w_qkv"].shape[0]

    def wspec(shape):                       # per-layer weight, indexed by layer
        return pl.BlockSpec(shape, lambda b, l: (l,) + (0,) * (len(shape) - 1))

    def cspec(shape):                       # constant (final LN) params
        return pl.BlockSpec(shape, lambda b, l: (0,) * len(shape))

    grid_spec = pltpu.PrefetchScalarGridSpec(
        num_scalar_prefetch=0,
        grid=(B, L),
        in_specs=[
            pl.BlockSpec((1, T, D), lambda b, l: (b, 0, 0)),      # x
            wspec((1, 1, D)), wspec((1, 1, D)),                   # ln w, b
            wspec((1, D, 3 * D)), wspec((1, 1, 3 * D)),           # qkv proj
            wspec((1, D, D)), wspec((1, 1, D)),                   # out proj
            wspec((1, D, 4 * D)), wspec((1, 1, 4 * D)),           # fc1
            wspec((1, 4 * D, D)), wspec((1, 1, D)),               # fc2
            cspec((1, D)), cspec((1, D)),                         # final LN w, b
        ],
        out_specs=pl.BlockSpec((1, T, D), lambda b, l: (b, 0, 0)),
        scratch_shapes=[pltpu.VMEM((T, D), jnp.float32)],         # running x
    )
    return pl.pallas_call(
        clip_fused_kernel,
        out_shape=jax.ShapeDtypeStruct((B, T, D), x.dtype),
        grid_spec=grid_spec,
        compiler_params=pltpu.CompilerParams(
            dimension_semantics=("parallel", "arbitrary")),
    )(x,
      params["ln_w"], params["ln_b"],
      params["w_qkv"], params["b_qkv"],
      params["w_out"], params["b_out"],
      params["w_fc1"], params["b_fc1"],
      params["w_fc2"], params["b_fc2"],
      params["final_ln_w"], params["final_ln_b"])


# ---------------------------------------------------------------------------
# Parameter init (deterministic, per-layer weights stacked) and full forward.
# ---------------------------------------------------------------------------
def init_params(key):
    D = N_EMBED
    kt, kq, ko, k1, k2 = jax.random.split(key, 5)

    def rnd(k, shape):
        return (jax.random.normal(k, shape, jnp.float32) * 0.02).astype(PARAM_DTYPE)

    return {
        "token_embedding": rnd(kt, (N_VOCAB, D)),
        # reference initializes positional embedding to zeros
        "positional_embedding": jnp.zeros((N_TOKEN, D), PARAM_DTYPE),
        "ln_w": jnp.ones((N_LAYERS, 1, D), PARAM_DTYPE),
        "ln_b": jnp.zeros((N_LAYERS, 1, D), PARAM_DTYPE),
        "w_qkv": rnd(kq, (N_LAYERS, D, 3 * D)),
        "b_qkv": jnp.zeros((N_LAYERS, 1, 3 * D), PARAM_DTYPE),
        "w_out": rnd(ko, (N_LAYERS, D, D)),
        "b_out": jnp.zeros((N_LAYERS, 1, D), PARAM_DTYPE),
        "w_fc1": rnd(k1, (N_LAYERS, D, 4 * D)),
        "b_fc1": jnp.zeros((N_LAYERS, 1, 4 * D), PARAM_DTYPE),
        "w_fc2": rnd(k2, (N_LAYERS, 4 * D, D)),
        "b_fc2": jnp.zeros((N_LAYERS, 1, D), PARAM_DTYPE),
        "final_ln_w": jnp.ones((1, D), PARAM_DTYPE),
        "final_ln_b": jnp.zeros((1, D), PARAM_DTYPE),
    }


@jax.jit
def clip_forward(tokens, params):
    # CLIP_Embedding: token gather (plain-JAX glue) + positional add
    x = jnp.take(params["token_embedding"], tokens, axis=0)      # (B, T, D)
    x = x + params["positional_embedding"][None, :, :]
    # TODO(synk): reference loop feeds `tokens` (not the running state) to every
    # layer; standard CLIP chains layers sequentially, which the fused kernel does.
    return clip_fused(x, params)


if __name__ == "__main__":
    key = jax.random.PRNGKey(0)
    k_tok, k_par = jax.random.split(key)
    tokens = jax.random.randint(k_tok, (BATCH, N_TOKEN), 0, N_VOCAB, dtype=jnp.int32)
    params = init_params(k_par)

    out = clip_forward(tokens, params)
    jax.block_until_ready(out)
    assert out.shape == (BATCH, N_TOKEN, N_EMBED)
    assert jnp.all(jnp.isfinite(out.astype(jnp.float32)))
    print("KERNEL_OK")
</pallas_src>

<mosaic_0001>
module attributes {stable_mosaic.version = 11 : i64} {
  func.func @clip_fused_kernel(%arg0: i32, %arg1: i32, %arg2: memref<1x16x128xbf16, #tpu.memory_space<vmem>>, %arg3: memref<1x1x128xbf16, #tpu.memory_space<vmem>>, %arg4: memref<1x1x128xbf16, #tpu.memory_space<vmem>>, %arg5: memref<1x128x384xbf16, #tpu.memory_space<vmem>>, %arg6: memref<1x1x384xbf16, #tpu.memory_space<vmem>>, %arg7: memref<1x128x128xbf16, #tpu.memory_space<vmem>>, %arg8: memref<1x1x128xbf16, #tpu.memory_space<vmem>>, %arg9: memref<1x128x512xbf16, #tpu.memory_space<vmem>>, %arg10: memref<1x1x512xbf16, #tpu.memory_space<vmem>>, %arg11: memref<1x512x128xbf16, #tpu.memory_space<vmem>>, %arg12: memref<1x1x128xbf16, #tpu.memory_space<vmem>>, %arg13: memref<1x128xbf16, #tpu.memory_space<vmem>>, %arg14: memref<1x128xbf16, #tpu.memory_space<vmem>>, %arg15: memref<1x16x128xbf16, #tpu.memory_space<vmem>>, %arg16: memref<16x128xf32, #tpu.memory_space<vmem>>) attributes {dimension_semantics = [#tpu.dimension_semantics<parallel>, #tpu.dimension_semantics<arbitrary>], iteration_bounds = array<i64: 2, 3>, scalar_prefetch = 0 : i64, scratch_operands = 1 : i64, tpu.core_type = #tpu.core_type<tc>, window_params = [{transform_indices = @transform_0, window_bounds = array<i64: 1, 16, 128>}, {transform_indices = @transform_1, window_bounds = array<i64: 1, 1, 128>}, {transform_indices = @transform_2, window_bounds = array<i64: 1, 1, 128>}, {transform_indices = @transform_3, window_bounds = array<i64: 1, 128, 384>}, {transform_indices = @transform_4, window_bounds = array<i64: 1, 1, 384>}, {transform_indices = @transform_5, window_bounds = array<i64: 1, 128, 128>}, {transform_indices = @transform_6, window_bounds = array<i64: 1, 1, 128>}, {transform_indices = @transform_7, window_bounds = array<i64: 1, 128, 512>}, {transform_indices = @transform_8, window_bounds = array<i64: 1, 1, 512>}, {transform_indices = @transform_9, window_bounds = array<i64: 1, 512, 128>}, {transform_indices = @transform_10, window_bounds = array<i64: 1, 1, 128>}, {pipeline_mode = #tpu.pipeline_mode<synchronous>, transform_indices = @transform_11, window_bounds = array<i64: 1, 128>}, {pipeline_mode = #tpu.pipeline_mode<synchronous>, transform_indices = @transform_12, window_bounds = array<i64: 1, 128>}, {transform_indices = @transform_13, window_bounds = array<i64: 1, 16, 128>}]} {
    %c0_i32 = arith.constant 0 : i32
    %0 = arith.cmpi eq, %arg1, %c0_i32 : i32
    %1 = arith.extui %0 : i1 to i32
    %c0_i32_0 = arith.constant 0 : i32
    %2 = arith.cmpi ne, %1, %c0_i32_0 : i32
    scf.if %2 {
      %c0_73 = arith.constant 0 : index
      %c0_74 = arith.constant 0 : index
      %c0_75 = arith.constant 0 : index
      %208 = vector.load %arg2[%c0_73, %c0_74, %c0_75] : memref<1x16x128xbf16, #tpu.memory_space<vmem>>, vector<1x16x128xbf16>
      %209 = vector.shape_cast %208 : vector<1x16x128xbf16> to vector<16x128xbf16>
      %210 = arith.extf %209 : vector<16x128xbf16> to vector<16x128xf32>
      %c0_76 = arith.constant 0 : index
      %c0_77 = arith.constant 0 : index
      %211 = vector.load %arg16[%c0_76, %c0_77] : memref<16x128xf32, #tpu.memory_space<vmem>>, vector<16x128xf32>
      tpu.vector_store %arg16[%c0_76, %c0_77], %210 {strides = array<i32>} : memref<16x128xf32, #tpu.memory_space<vmem>>, vector<16x128xf32>,
    } else {
    }
    %c0 = arith.constant 0 : index
    %c0_1 = arith.constant 0 : index
    %3 = vector.load %arg16[%c0, %c0_1] : memref<16x128xf32, #tpu.memory_space<vmem>>, vector<16x128xf32>
    %c0_2 = arith.constant 0 : index
    %c0_3 = arith.constant 0 : index
    %c0_4 = arith.constant 0 : index
    %4 = vector.load %arg3[%c0_2, %c0_3, %c0_4] : memref<1x1x128xbf16, #tpu.memory_space<vmem>>, vector<1x1x128xbf16>
    %5 = vector.shape_cast %4 : vector<1x1x128xbf16> to vector<1x128xbf16>
    %6 = arith.extf %5 : vector<1x128xbf16> to vector<1x128xf32>
    %c0_5 = arith.constant 0 : index
    %c0_6 = arith.constant 0 : index
    %c0_7 = arith.constant 0 : index
    %7 = vector.load %arg4[%c0_5, %c0_6, %c0_7] : memref<1x1x128xbf16, #tpu.memory_space<vmem>>, vector<1x1x128xbf16>
    %8 = vector.shape_cast %7 : vector<1x1x128xbf16> to vector<1x128xbf16>
    %9 = arith.extf %8 : vector<1x128xbf16> to vector<1x128xf32>
    %cst = arith.constant dense<0.000000e+00> : vector<16xf32>
    %10 = vector.multi_reduction <add>, %3, %cst [1] : vector<16x128xf32> to vector<16xf32>
    %11 = vector.shape_cast %10 : vector<16xf32> to vector<16x1xf32>
    %cst_8 = arith.constant 1.280000e+02 : f32
    %12 = vector.broadcast %cst_8 : f32 to vector<16x1xf32>
    %13 = arith.divf %11, %12 : vector<16x1xf32>
    %14 = vector.broadcast %13 : vector<16x1xf32> to vector<16x128xf32>
    %15 = arith.subf %3, %14 : vector<16x128xf32>
    %16 = arith.mulf %15, %15 : vector<16x128xf32>
    %cst_9 = arith.constant dense<0.000000e+00> : vector<16xf32>
    %17 = vector.multi_reduction <add>, %16, %cst_9 [1] : vector<16x128xf32> to vector<16xf32>
    %18 = vector.shape_cast %17 : vector<16xf32> to vector<16x1xf32>
    %cst_10 = arith.constant 1.280000e+02 : f32
    %19 = vector.broadcast %cst_10 : f32 to vector<16x1xf32>
    %20 = arith.divf %18, %19 : vector<16x1xf32>
    %21 = vector.broadcast %13 : vector<16x1xf32> to vector<16x128xf32>
    %22 = arith.subf %3, %21 : vector<16x128xf32>
    %cst_11 = arith.constant 9.99999974E-6 : f32
    %23 = vector.broadcast %cst_11 : f32 to vector<16x1xf32>
    %24 = arith.addf %20, %23 : vector<16x1xf32>
    %25 = math.rsqrt %24 : vector<16x1xf32>
    %26 = vector.broadcast %25 : vector<16x1xf32> to vector<16x128xf32>
    %27 = arith.mulf %22, %26 : vector<16x128xf32>
    %28 = vector.broadcast %6 : vector<1x128xf32> to vector<16x128xf32>
    %29 = arith.mulf %27, %28 : vector<16x128xf32>
    %30 = vector.broadcast %9 : vector<1x128xf32> to vector<16x128xf32>
    %31 = arith.addf %29, %30 : vector<16x128xf32>
    %32 = arith.truncf %31 : vector<16x128xf32> to vector<16x128xbf16>
    %c0_12 = arith.constant 0 : index
    %c0_13 = arith.constant 0 : index
    %c0_14 = arith.constant 0 : index
    %33 = vector.load %arg5[%c0_12, %c0_13, %c0_14] : memref<1x128x384xbf16, #tpu.memory_space<vmem>>, vector<1x128x384xbf16>
    %34 = vector.shape_cast %33 : vector<1x128x384xbf16> to vector<128x384xbf16>
    %cst_15 = arith.constant dense<0.000000e+00> : vector<16x384xf32>
    %35 = tpu.matmul %32, %34, %cst_15 {dimension_numbers = #tpu.dot_dimension_numbers<[1], [0], [0], [1], [0, 0, 1, 1], [], []>} : vector<16x128xbf16>, vector<128x384xbf16>, vector<16x384xf32> -> vector<16x384xf32>
    %c0_16 = arith.constant 0 : index
    %c0_17 = arith.constant 0 : index
    %c0_18 = arith.constant 0 : index
    %36 = vector.load %arg6[%c0_16, %c0_17, %c0_18] : memref<1x1x384xbf16, #tpu.memory_space<vmem>>, vector<1x1x384xbf16>
    %37 = vector.shape_cast %36 : vector<1x1x384xbf16> to vector<1x384xbf16>
    %38 = arith.extf %37 : vector<1x384xbf16> to vector<1x384xf32>
    %39 = vector.broadcast %38 : vector<1x384xf32> to vector<16x384xf32>
    %40 = arith.addf %35, %39 : vector<16x384xf32>
    %41 = vector.extract_strided_slice %40 {offsets = [0, 0], sizes = [16, 128], strides = [1, 1]} : vector<16x384xf32> to vector<16x128xf32>
    %42 = vector.extract_strided_slice %40 {offsets = [0, 128], sizes = [16, 128], strides = [1, 1]} : vector<16x384xf32> to vector<16x128xf32>
    %43 = vector.extract_strided_slice %40 {offsets = [0, 256], sizes = [16, 128], strides = [1, 1]} : vector<16x384xf32> to vector<16x128xf32>
    %c0_19 = arith.constant 0 : index
    %c0_20 = arith.constant 0 : index
    %c0_21 = arith.constant 0 : index
    %44 = vector.load %arg7[%c0_19, %c0_20, %c0_21] : memref<1x128x128xbf16, #tpu.memory_space<vmem>>, vector<1x128x128xbf16>
    %45 = vector.shape_cast %44 : vector<1x128x128xbf16> to vector<128x128xbf16>
    %c0_22 = arith.constant 0 : index
    %c0_23 = arith.constant 0 : index
    %c0_24 = arith.constant 0 : index
    %46 = vector.load %arg8[%c0_22, %c0_23, %c0_24] : memref<1x1x128xbf16, #tpu.memory_space<vmem>>, vector<1x1x128xbf16>
    %47 = vector.shape_cast %46 : vector<1x1x128xbf16> to vector<1x128xbf16>
    %48 = arith.extf %47 : vector<1x128xbf16> to vector<1x128xf32>
    %49 = vector.extract_strided_slice %41 {offsets = [0, 0], sizes = [16, 32], strides = [1, 1]} : vector<16x128xf32> to vector<16x32xf32>
    %50 = arith.truncf %49 : vector<16x32xf32> to vector<16x32xbf16>
    %51 = vector.extract_strided_slice %42 {offsets = [0, 0], sizes = [16, 32], strides = [1, 1]} : vector<16x128xf32> to vector<16x32xf32>
    %52 = arith.truncf %51 : vector<16x32xf32> to vector<16x32xbf16>
    %53 = vector.extract_strided_slice %43 {offsets = [0, 0], sizes = [16, 32], strides = [1, 1]} : vector<16x128xf32> to vector<16x32xf32>
    %54 = arith.truncf %53 : vector<16x32xf32> to vector<16x32xbf16>
    %55 = tpu.transpose %52, [1, 0] : vector<16x32xbf16> -> vector<32x16xbf16>
    %cst_25 = arith.constant dense<0.000000e+00> : vector<16x16xf32>
    %56 = tpu.matmul %50, %55, %cst_25 {dimension_numbers = #tpu.dot_dimension_numbers<[1], [0], [0], [1], [0, 0, 1, 1], [], []>} : vector<16x32xbf16>, vector<32x16xbf16>, vector<16x16xf32> -> vector<16x16xf32>
    %cst_26 = arith.constant 0.176776692 : f32
    %57 = vector.broadcast %cst_26 : f32 to vector<16x16xf32>
    %58 = arith.mulf %56, %57 : vector<16x16xf32>
    %cst_27 = arith.constant dense<0xFF800000> : vector<16xf32>
    %59 = vector.multi_reduction <maximumf>, %58, %cst_27 [1] : vector<16x16xf32> to vector<16xf32>
    %60 = vector.shape_cast %59 : vector<16xf32> to vector<16x1xf32>
    %61 = vector.broadcast %60 : vector<16x1xf32> to vector<16x16xf32>
    %62 = arith.subf %58, %61 : vector<16x16xf32>
    %63 = math.exp %62 : vector<16x16xf32>
    %cst_28 = arith.constant dense<0.000000e+00> : vector<16xf32>
    %64 = vector.multi_reduction <add>, %63, %cst_28 [1] : vector<16x16xf32> to vector<16xf32>
    %65 = vector.shape_cast %64 : vector<16xf32> to vector<16x1xf32>
    %66 = tpu.reciprocal %65 {approx = true} : vector<16x1xf32> -> vector<16x1xf32>
    %67 = vector.broadcast %66 : vector<16x1xf32> to vector<16x16xf32>
    %68 = arith.mulf %63, %67 : vector<16x16xf32>
    %69 = arith.truncf %68 : vector<16x16xf32> to vector<16x16xbf16>
    %cst_29 = arith.constant dense<0.000000e+00> : vector<16x32xf32>
    %70 = tpu.matmul %69, %54, %cst_29 {dimension_numbers = #tpu.dot_dimension_numbers<[1], [0], [0], [1], [0, 0, 1, 1], [], []>} : vector<16x16xbf16>, vector<16x32xbf16>, vector<16x32xf32> -> vector<16x32xf32>
    %71 = arith.truncf %70 : vector<16x32xf32> to vector<16x32xbf16>
    %72 = vector.extract_strided_slice %45 {offsets = [0, 0], sizes = [32, 128], strides = [1, 1]} : vector<128x128xbf16> to vector<32x128xbf16>
    %cst_30 = arith.constant dense<0.000000e+00> : vector<16x128xf32>
    %73 = tpu.matmul %71, %72, %cst_30 {dimension_numbers = #tpu.dot_dimension_numbers<[1], [0], [0], [1], [0, 0, 1, 1], [], []>} : vector<16x32xbf16>, vector<32x128xbf16>, vector<16x128xf32> -> vector<16x128xf32>
    %74 = vector.broadcast %48 : vector<1x128xf32> to vector<16x128xf32>
    %75 = arith.addf %74, %73 : vector<16x128xf32>
    %76 = vector.extract_strided_slice %41 {offsets = [0, 32], sizes = [16, 32], strides = [1, 1]} : vector<16x128xf32> to vector<16x32xf32>
    %77 = arith.truncf %76 : vector<16x32xf32> to vector<16x32xbf16>
    %78 = vector.extract_strided_slice %42 {offsets = [0, 32], sizes = [16, 32], strides = [1, 1]} : vector<16x128xf32> to vector<16x32xf32>
    %79 = arith.truncf %78 : vector<16x32xf32> to vector<16x32xbf16>
    %80 = vector.extract_strided_slice %43 {offsets = [0, 32], sizes = [16, 32], strides = [1, 1]} : vector<16x128xf32> to vector<16x32xf32>
    %81 = arith.truncf %80 : vector<16x32xf32> to vector<16x32xbf16>
    %82 = tpu.transpose %79, [1, 0] : vector<16x32xbf16> -> vector<32x16xbf16>
    %cst_31 = arith.constant dense<0.000000e+00> : vector<16x16xf32>
    %83 = tpu.matmul %77, %82, %cst_31 {dimension_numbers = #tpu.dot_dimension_numbers<[1], [0], [0], [1], [0, 0, 1, 1], [], []>} : vector<16x32xbf16>, vector<32x16xbf16>, vector<16x16xf32> -> vector<16x16xf32>
    %cst_32 = arith.constant 0.176776692 : f32
    %84 = vector.broadcast %cst_32 : f32 to vector<16x16xf32>
    %85 = arith.mulf %83, %84 : vector<16x16xf32>
    %cst_33 = arith.constant dense<0xFF800000> : vector<16xf32>
    %86 = vector.multi_reduction <maximumf>, %85, %cst_33 [1] : vector<16x16xf32> to vector<16xf32>
    %87 = vector.shape_cast %86 : vector<16xf32> to vector<16x1xf32>
    %88 = vector.broadcast %87 : vector<16x1xf32> to vector<16x16xf32>
    %89 = arith.subf %85, %88 : vector<16x16xf32>
    %90 = math.exp %89 : vector<16x16xf32>
    %cst_34 = arith.constant dense<0.000000e+00> : vector<16xf32>
    %91 = vector.multi_reduction <add>, %90, %cst_34 [1] : vector<16x16xf32> to vector<16xf32>
    %92 = vector.shape_cast %91 : vector<16xf32> to vector<16x1xf32>
    %93 = tpu.reciprocal %92 {approx = true} : vector<16x1xf32> -> vector<16x1xf32>
    %94 = vector.broadcast %93 : vector<16x1xf32> to vector<16x16xf32>
    %95 = arith.mulf %90, %94 : vector<16x16xf32>
    %96 = arith.truncf %95 : vector<16x16xf32> to vector<16x16xbf16>
    %cst_35 = arith.constant dense<0.000000e+00> : vector<16x32xf32>
    %97 = tpu.matmul %96, %81, %cst_35 {dimension_numbers = #tpu.dot_dimension_numbers<[1], [0], [0], [1], [0, 0, 1, 1], [], []>} : vector<16x16xbf16>, vector<16x32xbf16>, vector<16x32xf32> -> vector<16x32xf32>
    %98 = arith.truncf %97 : vector<16x32xf32> to vector<16x32xbf16>
    %99 = vector.extract_strided_slice %45 {offsets = [32, 0], sizes = [32, 128], strides = [1, 1]} : vector<128x128xbf16> to vector<32x128xbf16>
    %cst_36 = arith.constant dense<0.000000e+00> : vector<16x128xf32>
    %100 = tpu.matmul %98, %99, %cst_36 {dimension_numbers = #tpu.dot_dimension_numbers<[1], [0], [0], [1], [0, 0, 1, 1], [], []>} : vector<16x32xbf16>, vector<32x128xbf16>, vector<16x128xf32> -> vector<16x128xf32>
    %101 = arith.addf %75, %100 : vector<16x128xf32>
    %102 = vector.extract_strided_slice %41 {offsets = [0, 64], sizes = [16, 32], strides = [1, 1]} : vector<16x128xf32> to vector<16x32xf32>
    %103 = arith.truncf %102 : vector<16x32xf32> to vector<16x32xbf16>
    %104 = vector.extract_strided_slice %42 {offsets = [0, 64], sizes = [16, 32], strides = [1, 1]} : vector<16x128xf32> to vector<16x32xf32>
    %105 = arith.truncf %104 : vector<16x32xf32> to vector<16x32xbf16>
    %106 = vector.extract_strided_slice %43 {offsets = [0, 64], sizes = [16, 32], strides = [1, 1]} : vector<16x128xf32> to vector<16x32xf32>
    %107 = arith.truncf %106 : vector<16x32xf32> to vector<16x32xbf16>
    %108 = tpu.transpose %105, [1, 0] : vector<16x32xbf16> -> vector<32x16xbf16>
    %cst_37 = arith.constant dense<0.000000e+00> : vector<16x16xf32>
    %109 = tpu.matmul %103, %108, %cst_37 {dimension_numbers = #tpu.dot_dimension_numbers<[1], [0], [0], [1], [0, 0, 1, 1], [], []>} : vector<16x32xbf16>, vector<32x16xbf16>, vector<16x16xf32> -> vector<16x16xf32>
    %cst_38 = arith.constant 0.176776692 : f32
    %110 = vector.broadcast %cst_38 : f32 to vector<16x16xf32>
    %111 = arith.mulf %109, %110 : vector<16x16xf32>
    %cst_39 = arith.constant dense<0xFF800000> : vector<16xf32>
    %112 = vector.multi_reduction <maximumf>, %111, %cst_39 [1] : vector<16x16xf32> to vector<16xf32>
    %113 = vector.shape_cast %112 : vector<16xf32> to vector<16x1xf32>
    %114 = vector.broadcast %113 : vector<16x1xf32> to vector<16x16xf32>
    %115 = arith.subf %111, %114 : vector<16x16xf32>
    %116 = math.exp %115 : vector<16x16xf32>
    %cst_40 = arith.constant dense<0.000000e+00> : vector<16xf32>
    %117 = vector.multi_reduction <add>, %116, %cst_40 [1] : vector<16x16xf32> to vector<16xf32>
    %118 = vector.shape_cast %117 : vector<16xf32> to vector<16x1xf32>
    %119 = tpu.reciprocal %118 {approx = true} : vector<16x1xf32> -> vector<16x1xf32>
    %120 = vector.broadcast %119 : vector<16x1xf32> to vector<16x16xf32>
    %121 = arith.mulf %116, %120 : vector<16x16xf32>
    %122 = arith.truncf %121 : vector<16x16xf32> to vector<16x16xbf16>
    %cst_41 = arith.constant dense<0.000000e+00> : vector<16x32xf32>
    %123 = tpu.matmul %122, %107, %cst_41 {dimension_numbers = #tpu.dot_dimension_numbers<[1], [0], [0], [1], [0, 0, 1, 1], [], []>} : vector<16x16xbf16>, vector<16x32xbf16>, vector<16x32xf32> -> vector<16x32xf32>
    %124 = arith.truncf %123 : vector<16x32xf32> to vector<16x32xbf16>
    %125 = vector.extract_strided_slice %45 {offsets = [64, 0], sizes = [32, 128], strides = [1, 1]} : vector<128x128xbf16> to vector<32x128xbf16>
    %cst_42 = arith.constant dense<0.000000e+00> : vector<16x128xf32>
    %126 = tpu.matmul %124, %125, %cst_42 {dimension_numbers = #tpu.dot_dimension_numbers<[1], [0], [0], [1], [0, 0, 1, 1], [], []>} : vector<16x32xbf16>, vector<32x128xbf16>, vector<16x128xf32> -> vector<16x128xf32>
    %127 = arith.addf %101, %126 : vector<16x128xf32>
    %128 = vector.extract_strided_slice %41 {offsets = [0, 96], sizes = [16, 32], strides = [1, 1]} : vector<16x128xf32> to vector<16x32xf32>
    %129 = arith.truncf %128 : vector<16x32xf32> to vector<16x32xbf16>
    %130 = vector.extract_strided_slice %42 {offsets = [0, 96], sizes = [16, 32], strides = [1, 1]} : vector<16x128xf32> to vector<16x32xf32>
    %131 = arith.truncf %130 : vector<16x32xf32> to vector<16x32xbf16>
    %132 = vector.extract_strided_slice %43 {offsets = [0, 96], sizes = [16, 32], strides = [1, 1]} : vector<16x128xf32> to vector<16x32xf32>
    %133 = arith.truncf %132 : vector<16x32xf32> to vector<16x32xbf16>
    %134 = tpu.transpose %131, [1, 0] : vector<16x32xbf16> -> vector<32x16xbf16>
    %cst_43 = arith.constant dense<0.000000e+00> : vector<16x16xf32>
    %135 = tpu.matmul %129, %134, %cst_43 {dimension_numbers = #tpu.dot_dimension_numbers<[1], [0], [0], [1], [0, 0, 1, 1], [], []>} : vector<16x32xbf16>, vector<32x16xbf16>, vector<16x16xf32> -> vector<16x16xf32>
    %cst_44 = arith.constant 0.176776692 : f32
    %136 = vector.broadcast %cst_44 : f32 to vector<16x16xf32>
    %137 = arith.mulf %135, %136 : vector<16x16xf32>
    %cst_45 = arith.constant dense<0xFF800000> : vector<16xf32>
    %138 = vector.multi_reduction <maximumf>, %137, %cst_45 [1] : vector<16x16xf32> to vector<16xf32>
    %139 = vector.shape_cast %138 : vector<16xf32> to vector<16x1xf32>
    %140 = vector.broadcast %139 : vector<16x1xf32> to vector<16x16xf32>
    %141 = arith.subf %137, %140 : vector<16x16xf32>
    %142 = math.exp %141 : vector<16x16xf32>
    %cst_46 = arith.constant dense<0.000000e+00> : vector<16xf32>
    %143 = vector.multi_reduction <add>, %142, %cst_46 [1] : vector<16x16xf32> to vector<16xf32>
    %144 = vector.shape_cast %143 : vector<16xf32> to vector<16x1xf32>
    %145 = tpu.reciprocal %144 {approx = true} : vector<16x1xf32> -> vector<16x1xf32>
    %146 = vector.broadcast %145 : vector<16x1xf32> to vector<16x16xf32>
    %147 = arith.mulf %142, %146 : vector<16x16xf32>
    %148 = arith.truncf %147 : vector<16x16xf32> to vector<16x16xbf16>
    %cst_47 = arith.constant dense<0.000000e+00> : vector<16x32xf32>
    %149 = tpu.matmul %148, %133, %cst_47 {dimension_numbers = #tpu.dot_dimension_numbers<[1], [0], [0], [1], [0, 0, 1, 1], [], []>} : vector<16x16xbf16>, vector<16x32xbf16>, vector<16x32xf32> -> vector<16x32xf32>
    %150 = arith.truncf %149 : vector<16x32xf32> to vector<16x32xbf16>
    %151 = vector.extract_strided_slice %45 {offsets = [96, 0], sizes = [32, 128], strides = [1, 1]} : vector<128x128xbf16> to vector<32x128xbf16>
    %cst_48 = arith.constant dense<0.000000e+00> : vector<16x128xf32>
    %152 = tpu.matmul %150, %151, %cst_48 {dimension_numbers = #tpu.dot_dimension_numbers<[1], [0], [0], [1], [0, 0, 1, 1], [], []>} : vector<16x32xbf16>, vector<32x128xbf16>, vector<16x128xf32> -> vector<16x128xf32>
    %153 = arith.addf %127, %152 : vector<16x128xf32>
    %154 = arith.addf %153, %3 : vector<16x128xf32>
    %cst_49 = arith.constant dense<0.000000e+00> : vector<16xf32>
    %155 = vector.multi_reduction <add>, %154, %cst_49 [1] : vector<16x128xf32> to vector<16xf32>
    %156 = vector.shape_cast %155 : vector<16xf32> to vector<16x1xf32>
    %cst_50 = arith.constant 1.280000e+02 : f32
    %157 = vector.broadcast %cst_50 : f32 to vector<16x1xf32>
    %158 = arith.divf %156, %157 : vector<16x1xf32>
    %159 = vector.broadcast %158 : vector<16x1xf32> to vector<16x128xf32>
    %160 = arith.subf %154, %159 : vector<16x128xf32>
    %161 = arith.mulf %160, %160 : vector<16x128xf32>
    %cst_51 = arith.constant dense<0.000000e+00> : vector<16xf32>
    %162 = vector.multi_reduction <add>, %161, %cst_51 [1] : vector<16x128xf32> to vector<16xf32>
    %163 = vector.shape_cast %162 : vector<16xf32> to vector<16x1xf32>
    %cst_52 = arith.constant 1.280000e+02 : f32
    %164 = vector.broadcast %cst_52 : f32 to vector<16x1xf32>
    %165 = arith.divf %163, %164 : vector<16x1xf32>
    %166 = vector.broadcast %158 : vector<16x1xf32> to vector<16x128xf32>
    %167 = arith.subf %154, %166 : vector<16x128xf32>
    %cst_53 = arith.constant 9.99999974E-6 : f32
    %168 = vector.broadcast %cst_53 : f32 to vector<16x1xf32>
    %169 = arith.addf %165, %168 : vector<16x1xf32>
    %170 = math.rsqrt %169 : vector<16x1xf32>
    %171 = vector.broadcast %170 : vector<16x1xf32> to vector<16x128xf32>
    %172 = arith.mulf %167, %171 : vector<16x128xf32>
    %173 = vector.broadcast %6 : vector<1x128xf32> to vector<16x128xf32>
    %174 = arith.mulf %172, %173 : vector<16x128xf32>
    %175 = vector.broadcast %9 : vector<1x128xf32> to vector<16x128xf32>
    %176 = arith.addf %174, %175 : vector<16x128xf32>
    %177 = arith.truncf %176 : vector<16x128xf32> to vector<16x128xbf16>
    %c0_54 = arith.constant 0 : index
    %c0_55 = arith.constant 0 : index
    %c0_56 = arith.constant 0 : index
    %178 = vector.load %arg9[%c0_54, %c0_55, %c0_56] : memref<1x128x512xbf16, #tpu.memory_space<vmem>>, vector<1x128x512xbf16>
    %179 = vector.shape_cast %178 : vector<1x128x512xbf16> to vector<128x512xbf16>
    %cst_57 = arith.constant dense<0.000000e+00> : vector<16x512xf32>
    %180 = tpu.matmul %177, %179, %cst_57 {dimension_numbers = #tpu.dot_dimension_numbers<[1], [0], [0], [1], [0, 0, 1, 1], [], []>} : vector<16x128xbf16>, vector<128x512xbf16>, vector<16x512xf32> -> vector<16x512xf32>
    %c0_58 = arith.constant 0 : index
    %c0_59 = arith.constant 0 : index
    %c0_60 = arith.constant 0 : index
    %181 = vector.load %arg10[%c0_58, %c0_59, %c0_60] : memref<1x1x512xbf16, #tpu.memory_space<vmem>>, vector<1x1x512xbf16>
    %182 = vector.shape_cast %181 : vector<1x1x512xbf16> to vector<1x512xbf16>
    %183 = arith.extf %182 : vector<1x512xbf16> to vector<1x512xf32>
    %184 = vector.broadcast %183 : vector<1x512xf32> to vector<16x512xf32>
    %185 = arith.addf %180, %184 : vector<16x512xf32>
    %cst_61 = arith.constant 1.702000e+00 : f32
    %186 = vector.broadcast %cst_61 : f32 to vector<16x512xf32>
    %187 = arith.mulf %186, %185 : vector<16x512xf32>
    %188 = arith.negf %187 : vector<16x512xf32>
    %189 = math.exp %188 : vector<16x512xf32>
    %cst_62 = arith.constant 1.000000e+00 : f32
    %190 = vector.broadcast %cst_62 : f32 to vector<16x512xf32>
    %191 = arith.addf %190, %189 : vector<16x512xf32>
    %192 = arith.divf %190, %191 : vector<16x512xf32>
    %193 = arith.mulf %185, %192 : vector<16x512xf32>
    %194 = arith.truncf %193 : vector<16x512xf32> to vector<16x512xbf16>
    %c0_63 = arith.constant 0 : index
    %c0_64 = arith.constant 0 : index
    %c0_65 = arith.constant 0 : index
    %195 = vector.load %arg11[%c0_63, %c0_64, %c0_65] : memref<1x512x128xbf16, #tpu.memory_space<vmem>>, vector<1x512x128xbf16>
    %196 = vector.shape_cast %195 : vector<1x512x128xbf16> to vector<512x128xbf16>
    %cst_66 = arith.constant dense<0.000000e+00> : vector<16x128xf32>
    %197 = tpu.matmul %194, %196, %cst_66 {dimension_numbers = #tpu.dot_dimension_numbers<[1], [0], [0], [1], [0, 0, 1, 1], [], []>} : vector<16x512xbf16>, vector<512x128xbf16>, vector<16x128xf32> -> vector<16x128xf32>
    %c0_67 = arith.constant 0 : index
    %c0_68 = arith.constant 0 : index
    %c0_69 = arith.constant 0 : index
    %198 = vector.load %arg12[%c0_67, %c0_68, %c0_69] : memref<1x1x128xbf16, #tpu.memory_space<vmem>>, vector<1x1x128xbf16>
    %199 = vector.shape_cast %198 : vector<1x1x128xbf16> to vector<1x128xbf16>
    %200 = arith.extf %199 : vector<1x128xbf16> to vector<1x128xf32>
    %201 = vector.broadcast %200 : vector<1x128xf32> to vector<16x128xf32>
    %202 = arith.addf %197, %201 : vector<16x128xf32>
    %203 = arith.addf %202, %154 : vector<16x128xf32>
    %c0_70 = arith.constant 0 : index
    %c0_71 = arith.constant 0 : index
    %204 = vector.load %arg16[%c0_70, %c0_71] : memref<16x128xf32, #tpu.memory_space<vmem>>, vector<16x128xf32>
    tpu.vector_store %arg16[%c0_70, %c0_71], %203 {strides = array<i32>} : memref<16x128xf32, #tpu.memory_space<vmem>>, vector<16x128xf32>,
    %c2_i32 = arith.constant 2 : i32
    %205 = arith.cmpi eq, %arg1, %c2_i32 : i32
    %206 = arith.extui %205 : i1 to i32
    %c0_i32_72 = arith.constant 0 : i32
    %207 = arith.cmpi ne, %206, %c0_i32_72 : i32
    scf.if %207 {
      %c0_73 = arith.constant 0 : index
      %c0_74 = arith.constant 0 : index
      %208 = vector.load %arg13[%c0_73, %c0_74] : memref<1x128xbf16, #tpu.memory_space<vmem>>, vector<1x128xbf16>
      %209 = arith.extf %208 : vector<1x128xbf16> to vector<1x128xf32>
      %c0_75 = arith.constant 0 : index
      %c0_76 = arith.constant 0 : index
      %210 = vector.load %arg14[%c0_75, %c0_76] : memref<1x128xbf16, #tpu.memory_space<vmem>>, vector<1x128xbf16>
      %211 = arith.extf %210 : vector<1x128xbf16> to vector<1x128xf32>
      %cst_77 = arith.constant dense<0.000000e+00> : vector<16xf32>
      %212 = vector.multi_reduction <add>, %203, %cst_77 [1] : vector<16x128xf32> to vector<16xf32>
      %213 = vector.shape_cast %212 : vector<16xf32> to vector<16x1xf32>
      %cst_78 = arith.constant 1.280000e+02 : f32
      %214 = vector.broadcast %cst_78 : f32 to vector<16x1xf32>
      %215 = arith.divf %213, %214 : vector<16x1xf32>
      %216 = vector.broadcast %215 : vector<16x1xf32> to vector<16x128xf32>
      %217 = arith.subf %203, %216 : vector<16x128xf32>
      %218 = arith.mulf %217, %217 : vector<16x128xf32>
      %cst_79 = arith.constant dense<0.000000e+00> : vector<16xf32>
      %219 = vector.multi_reduction <add>, %218, %cst_79 [1] : vector<16x128xf32> to vector<16xf32>
      %220 = vector.shape_cast %219 : vector<16xf32> to vector<16x1xf32>
      %cst_80 = arith.constant 1.280000e+02 : f32
      %221 = vector.broadcast %cst_80 : f32 to vector<16x1xf32>
      %222 = arith.divf %220, %221 : vector<16x1xf32>
      %223 = vector.broadcast %215 : vector<16x1xf32> to vector<16x128xf32>
      %224 = arith.subf %203, %223 : vector<16x128xf32>
      %cst_81 = arith.constant 9.99999974E-6 : f32
      %225 = vector.broadcast %cst_81 : f32 to vector<16x1xf32>
      %226 = arith.addf %222, %225 : vector<16x1xf32>
      %227 = math.rsqrt %226 : vector<16x1xf32>
      %228 = vector.broadcast %227 : vector<16x1xf32> to vector<16x128xf32>
      %229 = arith.mulf %224, %228 : vector<16x128xf32>
      %230 = vector.broadcast %209 : vector<1x128xf32> to vector<16x128xf32>
      %231 = arith.mulf %229, %230 : vector<16x128xf32>
      %232 = vector.broadcast %211 : vector<1x128xf32> to vector<16x128xf32>
      %233 = arith.addf %231, %232 : vector<16x128xf32>
      %234 = arith.truncf %233 : vector<16x128xf32> to vector<16x128xbf16>
      %c0_82 = arith.constant 0 : index
      %c0_83 = arith.constant 0 : index
      %c0_84 = arith.constant 0 : index
      %235 = vector.load %arg15[%c0_82, %c0_83, %c0_84] : memref<1x16x128xbf16, #tpu.memory_space<vmem>>, vector<1x16x128xbf16>
      %236 = vector.shape_cast %235 : vector<1x16x128xbf16> to vector<16x128xbf16>
      %237 = vector.shape_cast %234 : vector<16x128xbf16> to vector<1x16x128xbf16>
      tpu.vector_store %arg15[%c0_82, %c0_83, %c0_84], %237 {strides = array<i32>} : memref<1x16x128xbf16, #tpu.memory_space<vmem>>, vector<1x16x128xbf16>,
    } else {
    }
    return
  }
  func.func @transform_0(%arg0: i32, %arg1: i32) -> (i32, i32, i32) {
    %c0_i32 = arith.constant 0 : i32
    %c0_i32_0 = arith.constant 0 : i32
    %c0_i32_1 = arith.constant 0 : i32
    return %arg0, %c0_i32, %c0_i32_0 : i32, i32, i32
  }
  func.func @transform_1(%arg0: i32, %arg1: i32) -> (i32, i32, i32) {
    %c0_i32 = arith.constant 0 : i32
    %c0_i32_0 = arith.constant 0 : i32
    %c0_i32_1 = arith.constant 0 : i32
    return %arg1, %c0_i32, %c0_i32_0 : i32, i32, i32
  }
  func.func @transform_2(%arg0: i32, %arg1: i32) -> (i32, i32, i32) {
    %c0_i32 = arith.constant 0 : i32
    %c0_i32_0 = arith.constant 0 : i32
    %c0_i32_1 = arith.constant 0 : i32
    return %arg1, %c0_i32, %c0_i32_0 : i32, i32, i32
  }
  func.func @transform_3(%arg0: i32, %arg1: i32) -> (i32, i32, i32) {
    %c0_i32 = arith.constant 0 : i32
    %c0_i32_0 = arith.constant 0 : i32
    %c0_i32_1 = arith.constant 0 : i32
    return %arg1, %c0_i32, %c0_i32_0 : i32, i32, i32
  }
  func.func @transform_4(%arg0: i32, %arg1: i32) -> (i32, i32, i32) {
    %c0_i32 = arith.constant 0 : i32
    %c0_i32_0 = arith.constant 0 : i32
    %c0_i32_1 = arith.constant 0 : i32
    return %arg1, %c0_i32, %c0_i32_0 : i32, i32, i32
  }
  func.func @transform_5(%arg0: i32, %arg1: i32) -> (i32, i32, i32) {
    %c0_i32 = arith.constant 0 : i32
    %c0_i32_0 = arith.constant 0 : i32
    %c0_i32_1 = arith.constant 0 : i32
    return %arg1, %c0_i32, %c0_i32_0 : i32, i32, i32
  }
  func.func @transform_6(%arg0: i32, %arg1: i32) -> (i32, i32, i32) {
    %c0_i32 = arith.constant 0 : i32
    %c0_i32_0 = arith.constant 0 : i32
    %c0_i32_1 = arith.constant 0 : i32
    return %arg1, %c0_i32, %c0_i32_0 : i32, i32, i32
  }
  func.func @transform_7(%arg0: i32, %arg1: i32) -> (i32, i32, i32) {
    %c0_i32 = arith.constant 0 : i32
    %c0_i32_0 = arith.constant 0 : i32
    %c0_i32_1 = arith.constant 0 : i32
    return %arg1, %c0_i32, %c0_i32_0 : i32, i32, i32
  }
  func.func @transform_8(%arg0: i32, %arg1: i32) -> (i32, i32, i32) {
    %c0_i32 = arith.constant 0 : i32
    %c0_i32_0 = arith.constant 0 : i32
    %c0_i32_1 = arith.constant 0 : i32
    return %arg1, %c0_i32, %c0_i32_0 : i32, i32, i32
  }
  func.func @transform_9(%arg0: i32, %arg1: i32) -> (i32, i32, i32) {
    %c0_i32 = arith.constant 0 : i32
    %c0_i32_0 = arith.constant 0 : i32
    %c0_i32_1 = arith.constant 0 : i32
    return %arg1, %c0_i32, %c0_i32_0 : i32, i32, i32
  }
  func.func @transform_10(%arg0: i32, %arg1: i32) -> (i32, i32, i32) {
    %c0_i32 = arith.constant 0 : i32
    %c0_i32_0 = arith.constant 0 : i32
    %c0_i32_1 = arith.constant 0 : i32
    return %arg1, %c0_i32, %c0_i32_0 : i32, i32, i32
  }
  func.func @transform_11(%arg0: i32, %arg1: i32) -> (i32, i32) {
    %c0_i32 = arith.constant 0 : i32
    %c0_i32_0 = arith.constant 0 : i32
    %c0_i32_1 = arith.constant 0 : i32
    return %c0_i32, %c0_i32_0 : i32, i32
  }
  func.func @transform_12(%arg0: i32, %arg1: i32) -> (i32, i32) {
    %c0_i32 = arith.constant 0 : i32
    %c0_i32_0 = arith.constant 0 : i32
    %c0_i32_1 = arith.constant 0 : i32
    return %c0_i32, %c0_i32_0 : i32, i32
  }
  func.func @transform_13(%arg0: i32, %arg1: i32) -> (i32, i32, i32) {
    %c0_i32 = arith.constant 0 : i32
    %c0_i32_0 = arith.constant 0 : i32
    %c0_i32_1 = arith.constant 0 : i32
    return %arg0, %c0_i32, %c0_i32_0 : i32, i32, i32
  }
}

</mosaic_0001>

<bundles_post_ra>
// kernel: clip_forward.1
= control target key start
LH: loop header
LB: loop body
LE: loop exit
PB: predicated region body
PF: predicated region fallthrough
CT: control target
= control target key end

     0   :  { %s4348_s0 = inlined_call_operand.vmem [shape: bf16[2,16,128], index: 0, kind: input, shape index: {}]   ;;  %s4349_s1 = inlined_call_operand.vmem [shape: bf16[3,1,128], index: 1, kind: input, shape index: {}]   ;;  %s4350_s2 = inlined_call_operand.vmem [shape: bf16[3,1,128], index: 2, kind: input, shape index: {}]   ;;  %s4351_s3 = inlined_call_operand.hbm [shape: bf16[3,128,384], index: 3, kind: input, shape index: {}]   ;;  %s4352_s4 = inlined_call_operand.vmem [shape: bf16[3,1,384], index: 4, kind: input, shape index: {}]   ;;  %s4353_s5 = inlined_call_operand.hbm [shape: bf16[3,128,128], index: 5, kind: input, shape index: {}]   ;;  %s4354_s6 = inlined_call_operand.vmem [shape: bf16[3,1,128], index: 6, kind: input, shape index: {}]   ;;  %s4355_s7 = inlined_call_operand.hbm [shape: bf16[3,128,512], index: 7, kind: input, shape index: {}]   ;;  %s4356_s8 = inlined_call_operand.vmem [shape: bf16[3,1,512], index: 8, kind: input, shape index: {}]   ;;  %s4357_s9 = inlined_call_operand.hbm [shape: bf16[3,512,128], index: 9, kind: input, shape index: {}]   ;;  %s4358_s10 = inlined_call_operand.vmem [shape: bf16[3,1,128], index: 10, kind: input, shape index: {}]   ;;  %s4359_s11 = inlined_call_operand.vmem [shape: bf16[1,128], index: 11, kind: input, shape index: {}]   ;;  %s4360_s12 = inlined_call_operand.vmem [shape: bf16[1,128], index: 12, kind: input, shape index: {}]   ;;  %s4361_s13 = inlined_call_operand.hbm [shape: bf16[2,16,128], index: 13, kind: output, shape index: {}]  }
   0x1   :  { %4380 = sst [smem:[#allocation30_spill]] %s4349_s1 }
   0x2   :  { %4381 = sst [smem:[#allocation31_spill]] %s4350_s2 }
   0x3   :  { %4382 = sst [smem:[#allocation32_spill]] %s4351_s3 }
   0x4   :  { %4383 = sst [smem:[#allocation33_spill]] %s4352_s4 }
   0x5   :  { %4384 = sst [smem:[#allocation34_spill]] %s4353_s5 }
   0x6   :  { %4385 = sst [smem:[#allocation35_spill]] %s4354_s6 }
   0x7   :  { %4386 = sst [smem:[#allocation36_spill]] %s4355_s7 }
   0x8   :  { %4387 = sst [smem:[#allocation37_spill]] %s4356_s8 }
   0x9   :  { %4388 = sst [smem:[#allocation38_spill]] %s4357_s9 }
   0xa   :  { %4389 = sst [smem:[#allocation39_spill]] %s4358_s10 }
   0xb   :  { %4390 = sst [smem:[#allocation40_spill]] %s4359_s11 }
   0xc   :  { %4391 = sst [smem:[#allocation41_spill]] %s4360_s12 }
   0xd   :  { %4392 = sst [smem:[#allocation42_spill]] %s4361_s13 }
   0xe   :  { %18 = vsyncpa [#allocation4], 0 }
   0xf   :  { %20 = vsyncpa [#allocation4 + $0x1], 0 }
  0x10   :  { %21 = vsyncpa [#allocation7], 0 }
  0x11   :  { %23 = vsyncpa [#allocation7 + $0x1], 0 }
  0x12   :  { %24 = vsyncpa [#allocation10], 0 }
  0x13   :  { %26 = vsyncpa [#allocation10 + $0x1], 0 }
  0x14   :  { %27 = vsyncpa [#allocation5], 0 }
  0x15   :  { %29 = vsyncpa [#allocation5 + $0x1], 0  ;;  %s3598_s25 = smov 0   ;;  %s3600_s26 = smov 0  }
  0x16   :  { %s3602_s27 = smov 0   ;;  %s3604_s28 = smov 0  }
  0x17   :  { %s3606_s29 = smov 0   ;;  %s3608_s30 = smov 0  }
  0x18   :  { %s3610_s14 = smov 0   ;;  %s3612_s15 = smov 0  }
  0x19   :  { %s3614_s16 = smov 0   ;;  %s3616_s17 = smov 0  }
  0x1a   :  { %s3618_s18 = smov 0  }
  0x1b LB: > { %4393 = sst [smem:[#allocation16_spill]] %s3475_s25  ;;  %s3652_s19 = sadd.s32 4294967295, %s3515_s18   ;;  %s3515_s18 = sphi %s3618_s18, %s35_s18   ;;  %s3511_s17 = sphi %s3616_s17, %s4457_s17   ;;  %s3507_s16 = sphi %s3614_s16, %s4456_s16   ;;  %s3503_s15 = sphi %s3612_s15, %s4455_s15   ;;  %s3499_s14 = sphi %s3610_s14, %s4454_s14   ;;  %s3495_s30 = sphi %s3608_s30, %s4453_s30   ;;  %s3491_s29 = sphi %s3606_s29, %s4452_s29   ;;  %s3487_s28 = sphi %s3604_s28, %s4451_s28   ;;  %s3483_s27 = sphi %s3602_s27, %s4450_s27   ;;  %s3479_s26 = sphi %s3600_s26, %s4449_s26   ;;  %s3475_s25 = sphi %s3598_s25, %s4448_s25  }
  0x1c   : > { %4394 = sst [smem:[#allocation17_spill]] %s3479_s26  ;;  %s2513_s20 = sadd.s32 4294967294, %s3515_s18  }
  0x1d   : > { %4395 = sst [smem:[#allocation18_spill]] %s3483_s27  ;;  %s44_s21 = sadd.s32 1, %s3507_s16 }
  0x1e   : > { %4396 = sst [smem:[#allocation19_spill]] %s3491_s29  ;;  %s47_s22 = sadd.s32 1, %s3511_s17 }
  0x1f   : > { %4397 = sst [smem:[#allocation20_spill]] %s3495_s30  ;;  %p45_p0 = scmp.ge.s32.totalorder %s44_s21, 3 }
  0x20   : > { %4398 = sst [smem:[#allocation21_spill]] %s3507_s16  ;;  %s132_s23 = sadd.s32 1, %s3495_s30 }
  0x21   : > { %4399 = sst [smem:[#allocation22_spill]] %s3511_s17  ;;  %p139_p1 = scmp.ne.s32.totalorder %s3495_s30, %s3491_s29 }
  0x22   : > { %4400 = sst [smem:[#allocation23_spill]] %s3515_s18  ;;  %p140_p2 = scmp.eq.s32.totalorder %s3515_s18, 0 }
  0x23   : > { %s4459_s21 = smov (%p45_p0, %s44_s21), 0  ;;  %s4461_s22 = smov (!%p45_p0, %s47_s22), %s3511_s17 }
  0x24   : > { %4401 = sst [smem:[#allocation24_spill]] %s4459_s21  ;;  %s129_s24 = ssub.s32 %s3507_s16, %s4459_s21 }
  0x25   : > { %p3666_p3 = por %p140_p2, %p139_p1  ;;  %p49_p4 = scmp.ge.s32.totalorder %s4461_s22, 2 }
  0x26   : > { %p130_p5 = scmp.eq.s32.totalorder %s129_s24, 0  ;;  %p145_p6 = scmp.ne.s32.totalorder %s3491_s29, %s3487_s28 }
  0x27   : > { %p146_p7 = scmp.eq.s32.totalorder %s3652_s19, 0  ;;  %s4463_s22 = smov (%p49_p4, %s4461_s22), 0 }
  0x28   : > { %4403 = sst [smem:[#allocation25_spill]] %s4463_s22  ;;  %s379_s11 = ssub.s32 %s3511_s17, %s4463_s22 }
  0x29   : > { %s3675_s12 = scalar_select %p130_p5, %s3495_s30, %s132_s23  }
  0x2a   : > { %p3677_p8 = por %p146_p7, %p145_p6  ;;  %p380_p9 = scmp.eq.s32.totalorder %s379_s11, 0 }
  0x2b   : > { %4404 = sst [smem:[#allocation26_spill]] %s3675_s12  ;;  %s382_s10 = sadd.s32 1, %s3483_s27 }
  0x2c   : > { %p392_p10 = scmp.ne.s32.totalorder %s3483_s27, %s3479_s26  ;;  %p393_p11 = scmp.eq.s32.totalorder %s3652_s19, 5 }
  0x2d   : > { %s3688_s24 = scalar_select %p380_p9, %s3483_s27, %s382_s10  }
  0x2e   : > { %p3690_p12 = por %p393_p11, %p392_p10  ;;  %p398_p13 = scmp.ne.s32.totalorder %s3479_s26, %s3475_s25 }
  0x2f   : > { %4406 = sst [smem:[#allocation27_spill]] %s3688_s24  ;;  %p399_p0 = scmp.eq.s32.totalorder %s2513_s20, 5 }
  0x30   : > { %s4407_s28 = scalar_select %p3690_p12, 1, 0 }
  0x31   : > { %p3086_p1 = scmp.lt.s32.totalorder %s3515_s18, 6  ;;  %s3698_s23 = sand.u32 1, %s3495_s30  }
  0x32   : > { %4408 = sst [smem:[#allocation28_spill]] %s4407_s28  ;;  %p3700_p2 = por %p399_p0, %p398_p13 }
  0x33   : > { %s474_s11 = sand.u32 1, %s3515_s18   ;;  %p3707_p4 = pnand %p3086_p1, %p3666_p3 }
  0x34   : > { %s4409_s12 = scalar_select %p3700_p2, 1, 0 }
  0x35   : > { %s2517_s22 = sshll.u32 %s3698_s23, 6  ;;  %s2945_s20 = sshll.u32 %s3507_s16, 6 }
  0x36   : > { %4410 = sst [smem:[#allocation29_spill]] %s4409_s12  ;;  %s478_s27 = scalar_lea.vmem [#allocation6], %s2517_s22 }
  0x37   : > { %s4412_s5 = sld [smem:[#allocation34_spill]]  ;;  %s486_s25 = sshll.u32 %s478_s27, 4  ;;  %s487_s25 = int_to_ptr.vmem [resolvable:$true] %s486_s25 }
  0x38   : > { %p2526_p5 = scmp.ge.s32.totalorder %s3515_s18, 1  ;;  %s3717_s13 = scalar_lea.sflag [#allocation7], %s474_s11 }
  0x39   : > { %s4372_s12 = smov 64   ;;  %s4373_s8 = smov 4  }
  0x3a   : > { %p557_p3 = scmp.lt.s32.totalorder %s3515_s18, 7  ;;  %s3055_s30 = smul.u32 192, %s3698_s23 }
  0x3b   : > { %s3056_s17 = smul.u32 192, %s3507_s16  ;;  %s4414_s3 = sld [smem:[#allocation32_spill]] }
  0x3c   : > { %p3726_p6 = pnand %p2526_p5, %p557_p3  ;;  %s2946_s18 = sshll.u32 %s3507_s16, 8 }
  0x3d   : > { %s483_s24 = scalar_lea.hbm %s4412_s5, %s2945_s20  ;;  %s449_s20 = scalar_lea.vmem [#allocation3], %s3055_s30 }
  0x3e   : > { %s484_s28 = sshll.u32 %s483_s24, 4  ;;  %s457_s5 = sshll.u32 %s449_s20, 4  ;;  %s485_s28 = int_to_ptr.hbm [resolvable:$true] %s484_s28  ;;  %s458_s5 = int_to_ptr.vmem [resolvable:$true] %s457_s5 }
  0x3f   : > { %3075 = dma.hbm_to_vmem [thread:$0]  (!%p3707_p4), %s485_s28, 1024, %s487_s25, %s3717_s13, %s4372_s12, %s4372_s12, %s4373_s8  }
  0x40   : > { %s2520_s25 = sshll.u32 %s3698_s23, 8  ;;  %s446_s28 = scalar_lea.sflag [#allocation4], %s3698_s23 }
  0x41   : > { %s454_s11 = scalar_lea.hbm %s4414_s3, %s3056_s17  ;;  %s3519_s12 = smov 192  }
  0x42   : > { %s455_s4 = sshll.u32 %s454_s11, 4  ;;  %s3520_s8 = smov 12   ;;  %s456_s4 = int_to_ptr.hbm [resolvable:$true] %s455_s4 }
  0x43   : > { %3072 = dma.hbm_to_vmem [thread:$0]  (!%p3707_p4), %s456_s4, 3072, %s458_s5, %s446_s28, %s3519_s12, %s3519_s12, %s3520_s8  }
  0x44   : > { %s4415_s7 = sld [smem:[#allocation36_spill]]  ;;  %s506_s30 = scalar_lea.vmem [#allocation8], %s2520_s25 }
  0x45   : > { %s514_s17 = sshll.u32 %s506_s30, 4  ;;  %s3521_s11 = smov 256   ;;  %s515_s17 = int_to_ptr.vmem [resolvable:$true] %s514_s17 }
  0x46   : > { %s3522_s20 = smov 16   ;;  %s4416_s9 = sld [smem:[#allocation38_spill]] }
  0x47   : > { %s535_s8 = scalar_lea.vmem [#allocation9], %s2520_s25  ;;  %s532_s2 = scalar_lea.sflag [#allocation10], %s3698_s23 }
  0x48   : > { %s543_s12 = sshll.u32 %s535_s8, 4  ;;  %s4417_s6 = smov 4   ;;  %s544_s12 = int_to_ptr.vmem [resolvable:$true] %s543_s12 }
  0x49   : > { %s4418_s28 = smov 64  }
  0x4a   : > { %s511_s22 = scalar_lea.hbm %s4415_s7, %s2946_s18 }
  0x4b   : > { %s512_s24 = sshll.u32 %s511_s22, 4  ;;  %561 = sbr.rel (%p3726_p6) target bundleno = 2762 (0xaca), region = 72  ;;  %s513_s24 = int_to_ptr.hbm [resolvable:$true] %s512_s24 }
  0x4c   : > { %3078 = dma.hbm_to_vmem [thread:$0]  (!%p3707_p4), %s513_s24, 4096, %s515_s17, %s3717_s13, %s3521_s11, %s3521_s11, %s3522_s20  }
  0x4d   : > { %s540_s4 = scalar_lea.hbm %s4416_s9, %s2946_s18  ;;  %s563_s13 = sand.u32 (!%p3726_p6), 1, %s3491_s29  }
  0x4e   : > { %s541_s5 = sshll.u32 %s540_s4, 4  ;;  %s3057_s22 = smul.u32 (!%p3726_p6), 192, %s563_s13  ;;  %s542_s5 = int_to_ptr.hbm [resolvable:$true] %s541_s5 }
  0x4f   : > { %3081 = dma.hbm_to_vmem [thread:$0]  (!%p3707_p4), %s542_s5, 4096, %s544_s12, %s532_s2, %s4418_s28, %s4418_s28, %s4417_s6  }
  0x50   : > { %s564_s1 = scalar_lea.sflag [#allocation4], %s563_s13  ;;  %s3758_s3 = scalar_lea.vmem [#allocation3], %s3057_s22 }
  0x51   : > { %3458 = dma.done.wait (%p3677_p8), %s564_s1, 3072  }
  0x52   : > { %3460 = vsyncadd (%p3677_p8), %s564_s1, 4294964224  ;;  %s573_s18 = sand.u32 1, %s3652_s19   ;;  %s2527_s23 = sshll.u32 %s563_s13, 6 }
  0x53   : > { %s574_s10 = scalar_lea.sflag [#allocation7], %s573_s18  ;;  %s3765_s25 = scalar_lea.vmem [#allocation6], %s2527_s23 }
  0x54   : > { %3462 = dma.done.wait (%p3677_p8), %s574_s10, 5120  }
  0x55   : > { %3464 = vsyncadd (%p3677_p8), %s574_s10, 4294962176  ;;  %s2528_s27 = sshll.u32 %s563_s13, 8  ;;  %s594_s17 = scalar_lea.sflag [#allocation10], %s563_s13 }
  0x56   : > { %s3771_s30 = scalar_lea.vmem [#allocation8], %s2528_s27  ;;  %s3773_s24 = scalar_lea.vmem [#allocation9], %s2528_s27 }
  0x57   : > { %3466 = dma.done.wait (%p3677_p8), %s594_s17, 4096  }
  0x58   : > { %3468 = vsyncadd (%p3677_p8), %s594_s17, 4294963200  ;;  %s4376_s19 = sand.u32 1, %s3479_s26   ;;  %p681_p7 = scmp.lt.s32.totalorder %s3503_s15, 1 }
  0x59   : > { %s3783_s11 = sshll.u32 %s4376_s19, 3  ;;  %p686_p9 = scmp.lt.s32.totalorder %s3499_s14, 2 }
  0x5a   : > { %s682_s20 = scalar_select %p681_p7, %s3503_s15, 1 }
  0x5b   : > { %s3788_s4 = scalar_select %p686_p9, %s3499_s14, 2 }
  0x5c   : > { %s2948_s21 = sshll.u32 %s682_s20, 3  ;;  %s4419_s28 = sld [smem:[#allocation30_spill]] }
  0x5d   : > { %s685_s12 = scalar_lea.vmem %s4348_s0, %s2948_s21  ;;  %s4420_s18 = sld [smem:[#allocation31_spill]] }
  0x5e   : > { %s3058_s10 = smul.u32 3, %s3788_s4  ;;  %s4421_s19 = sld [smem:[#allocation35_spill]] }
  0x5f   : > { %s2533_s9 = sshll.u32 %s3788_s4, 2  ;;  %s4422_s29 = sld [smem:[#allocation33_spill]] }
  0x60   : > { %s4423_s8 = sld [smem:[#allocation37_spill]]  ;;  %p2534_p8 = scmp.ne.s32.totalorder %s3499_s14, 0 }
  0x61   : > { %s4424_s22 = sld [smem:[#allocation39_spill]] }
  0x62   : > { %s688_s13 = scalar_lea.vmem %s4419_s28, %s3788_s4 }
  0x63   : > { %s691_s23 = scalar_lea.vmem %s4420_s18, %s3788_s4  ;;  %s680_s18 = scalar_lea.vmem [#allocation11], %s3783_s11 }
  0x64   : > { %s698_s7 = scalar_lea.vmem %s4421_s19, %s3788_s4  ;;  %710 = sbr.rel (%p2534_p8) target bundleno = 110 (0x6e), region = 92 }
  0x65   : > { %s3810_s26 = scalar_lea.vmem %s4422_s29, %s3058_s10 }
  0x66   : > { %s3815_s2 = scalar_lea.vmem %s4423_s8, %s2533_s9 }
  0x67   : > { %s705_s1 = scalar_lea.vmem %s4424_s22, %s3788_s4 }
  0x69   : > { %v3047_v0 = vld [vmem:[%s685_s12] sm:$0xff]  }
  0x6a   : > { %v3048_v1 = vunpack.c.l.bf16 %v3047_v0  ;;  %v3049_v2 = vunpack.c.h.bf16 %v3047_v0 }
  0x6c   : > { %715 = vst [vmem:[#allocation2] sm:$0xff] %v3048_v1 }
  0x6d   : > { %716 = vst [vmem:[#allocation2 + $0x8] sm:$0xff] %v3049_v2 }
  0x6e PF: > { %v3523_v5 = vmov 128.0   ;;  %v2621_v20 = vld [vmem:[%s3758_s3 + $0xa8] sm:$0xf]  ;;  %v2971_v21 = vld [vmem:[%s3758_s3 + $0xb0] sm:$0xf0]  ;;  %vm1012_vm7 = vcmask 261120  }
  0x6f   : > { %3187 = vrcp.f32 %v3523_v5  ;;  %v2970_v22 = vld [vmem:[%s3758_s3 + $0xac] sm:$0xf]  ;;  %v2622_v23 = vor.u32 %v2971_v21, %v2621_v20  ;;  %v2623_v24 = vld [vmem:[%s3758_s3 + $0xb4] sm:$0xf0]  ;;  %v2629_v25 = vld [vmem:[%s3758_s3 + $0xb0] sm:$0xf] }
  0x70   : > { %v2972_v26 = vld [vmem:[%s3758_s3 + $0xb8] sm:$0xf0]  ;;  %v2626_v27 = vor.u32 %v2970_v22, %v2623_v24  ;;  %v2609_v29 = vld [vmem:[%s3758_s3 + $0x90] sm:$0xf]  ;;  %v2967_v31 = vld [vmem:[%s3758_s3 + $0x94] sm:$0xf] }
  0x71   : > { %v2630_v28 = vor.u32 %v2972_v26, %v2629_v25  ;;  %949 = vmatpush.bf16.msra.mxu0 %v2622_v23  ;;  %v2968_v30 = vld [vmem:[%s3758_s3 + $0x98] sm:$0xf0]  ;;  %v2611_v33 = vld [vmem:[%s3758_s3 + $0x9c] sm:$0xf0]  ;;  %v2617_v34 = vld [vmem:[%s3758_s3 + $0x98] sm:$0xf] }
  0x72   : > { %963 = vmatpush.bf16.msra.mxu1 %v2626_v27  ;;  %v2610_v32 = vor.u32 %v2968_v30, %v2609_v29  ;;  %v2969_v35 = vld [vmem:[%s3758_s3 + $0xa0] sm:$0xf0]  ;;  %v2614_v36 = vor.u32 %v2967_v31, %v2611_v33  ;;  %v2597_v38 = vld [vmem:[%s3758_s3 + $0x78] sm:$0xf]  ;;  %v2964_v40 = vld [vmem:[%s3758_s3 + $0x7c] sm:$0xf] }
  0x73   : > { %v3823_v3 = vld [vmem:[#allocation2] sm:$0xff]  ;;  %977 = vmatpush.bf16.msra.mxu2 %v2630_v28  ;;  %v2618_v37 = vor.u32 %v2969_v35, %v2617_v34  ;;  %v2965_v39 = vld [vmem:[%s3758_s3 + $0x80] sm:$0xf0]  ;;  %v2599_v42 = vld [vmem:[%s3758_s3 + $0x84] sm:$0xf0]  ;;  %vm1035_vm8 = vcmask 130048  }
  0x74   : > { %723 = vadd.xlane.f32.xlu0 %v3823_v3  ;;  %v3826_v4 = vld [vmem:[#allocation2 + $0x8] sm:$0xff]  ;;  %v2598_v41 = vor.u32 %v2965_v39, %v2597_v38  ;;  %v2605_v43 = vld [vmem:[%s3758_s3 + $0x80] sm:$0xf]  ;;  %v2966_v44 = vld [vmem:[%s3758_s3 + $0x88] sm:$0xf0]  ;;  %v2602_v45 = vor.u32 %v2964_v40, %v2599_v42  ;;  %p2939_p10 = scmp.ne.s32.totalorder %s3499_s14, 2 }
  0x75   : > { %v3188_v6 = vpop.eup %3187  ;;  %950 = vmatpush.bf16.msra.mxu0 %v2610_v32  ;;  %v2606_v46 = vor.u32 %v2966_v44, %v2605_v43  ;;  %v2585_v47 = vld [vmem:[%s3758_s3 + $0x60] sm:$0xf]  ;;  %v2962_v48 = vld [vmem:[%s3758_s3 + $0x68] sm:$0xf0]  ;;  %v2961_v49 = vld [vmem:[%s3758_s3 + $0x64] sm:$0xf] }
  0x76   : > { %v728_v7 = vmul.f32 128.0, %v3188_v6  ;;  %vm732_vm0 = vweird.f32 %v3188_v6  ;;  %964 = vmatpush.bf16.msra.mxu1 %v2614_v36  ;;  %v2586_v50 = vor.u32 %v2962_v48, %v2585_v47  ;;  %v2587_v51 = vld [vmem:[%s3758_s3 + $0x6c] sm:$0xf0]  ;;  %v2593_v52 = vld [vmem:[%s3758_s3 + $0x68] sm:$0xf]  ;;  %s4439_s4 = sld [smem:[#allocation40_spill]] (!%p2939_p10) }
  0x77   : > { %978 = vmatpush.bf16.msra.mxu2 %v2618_v37  ;;  %v2963_v53 = vld [vmem:[%s3758_s3 + $0x70] sm:$0xf0]  ;;  %v2590_v54 = vor.u32 %v2961_v49, %v2587_v51  ;;  %v2573_v56 = vld [vmem:[%s3758_s3 + $0x48] sm:$0xf]  ;;  %v2958_v58 = vld [vmem:[%s3758_s3 + $0x4c] sm:$0xf] }
  0x78   : > { %v729_v8 = vsub.f32 1.0, %v728_v7  ;;  %v2594_v55 = vor.u32 %v2963_v53, %v2593_v52  ;;  %v2959_v57 = vld [vmem:[%s3758_s3 + $0x50] sm:$0xf0]  ;;  %v2575_v60 = vld [vmem:[%s3758_s3 + $0x54] sm:$0xf0]  ;;  %s4440_s5 = sld [smem:[#allocation41_spill]] (!%p2939_p10) }
  0x79   : > { %951 = vmatpush.bf16.msra.mxu0 %v2598_v41  ;;  %v2574_v59 = vor.u32 %v2959_v57, %v2573_v56  ;;  %v2581_v61 = vld [vmem:[%s3758_s3 + $0x50] sm:$0xf]  ;;  %v2960_v62 = vld [vmem:[%s3758_s3 + $0x58] sm:$0xf0]  ;;  %v2578_v63 = vor.u32 %v2958_v58, %v2575_v60  ;;  %v2955_v5 = vld [vmem:[%s3758_s3 + $0x34] sm:$0xf] }
  0x7a   : > { %v730_v9 = vmul.f32 %v3188_v6, %v729_v8  ;;  %965 = vmatpush.bf16.msra.mxu1 %v2602_v45  ;;  %v2582_v0 = vor.u32 %v2960_v62, %v2581_v61  ;;  %v2561_v1 = vld [vmem:[%s3758_s3 + $0x30] sm:$0xf]  ;;  %v2956_v2 = vld [vmem:[%s3758_s3 + $0x38] sm:$0xf0]  ;;  %v2563_v7 = vld [vmem:[%s3758_s3 + $0x3c] sm:$0xf0] }
  0x7b   : > { %979 = vmatpush.bf16.msra.mxu2 %v2606_v46  ;;  %v2569_v8 = vld [vmem:[%s3758_s3 + $0x38] sm:$0xf]  ;;  %v2557_v20 = vld [vmem:[%s3758_s3 + $0x20] sm:$0xf]  ;;  %v2954_v21 = vld [vmem:[%s3758_s3 + $0x28] sm:$0xf0] }
  0x7c   : > { %725 = vadd.xlane.f32.xlu0 %v3826_v4  ;;  %v731_v10 = vadd.f32 %v3188_v6, %v730_v9  ;;  %v2957_v9 = vld [vmem:[%s3758_s3 + $0x40] sm:$0xf0]  ;;  %v2558_v23 = vor.u32 %v2954_v21, %v2557_v20  ;;  %v2537_v24 = vld [vmem:[%s3758_s3] sm:$0xf]  ;;  %v2950_v25 = vld [vmem:[%s3758_s3 + $0x8] sm:$0xf0] }
  0x7d   : > { %952 = vmatpush.bf16.msra.mxu0 %v2586_v50  ;;  %v2949_v26 = vld [vmem:[%s3758_s3 + $0x4] sm:$0xf]  ;;  %v2538_v28 = vor.u32 %v2950_v25, %v2537_v24  ;;  %v2539_v29 = vld [vmem:[%s3758_s3 + $0xc] sm:$0xf0]  ;;  %v2545_v30 = vld [vmem:[%s3758_s3 + $0x8] sm:$0xf] }
  0x7e   : > { %v3829_v11 = vsel %vm732_vm0, %v3188_v6, %v731_v10  ;;  %966 = vmatpush.bf16.msra.mxu1 %v2590_v54  ;;  %v2562_v6 = vor.u32 %v2956_v2, %v2561_v1  ;;  %v2566_v10 = vor.u32 %v2955_v5, %v2563_v7  ;;  %v2951_v31 = vld [vmem:[%s3758_s3 + $0x10] sm:$0xf0]  ;;  %v2542_v33 = vor.u32 %v2949_v26, %v2539_v29  ;;  %v719_v47 = vld [vmem:[%s688_s13] sm:$0x1]  ;;  %s3524_s13 = smov 96  }
  0x7f   : > { %980 = vmatpush.bf16.msra.mxu2 %v2594_v55  ;;  %v2546_v34 = vor.u32 %v2951_v31, %v2545_v30  ;;  %v720_v49 = vunpack.c.l.bf16 %v719_v47  ;;  %v721_v52 = vld [vmem:[%s691_s23] sm:$0x1]  ;;  %s3526_s23 = smov 32  }
  0x80   : > { %v722_v55 = vunpack.c.l.bf16 %v721_v52  ;;  %v809_v1 = vld [vmem:[%s3810_s26] sm:$0x7]  ;;  %s3525_s26 = smov 64  }
  0x81   : > { %953 = vmatpush.bf16.msra.mxu0 %v2574_v59  ;;  %v3904_v56 = vperm.slane %v720_v49, 0  ;;  %v810_v2 = vunpack.c.l.bf16 %v809_v1  ;;  %v2974_v1 = vld [vmem:[%s3765_s25 + $0x8] sm:$0xff] }
  0x82   : > { %967 = vmatpush.bf16.msra.mxu1 %v2578_v63  ;;  %v3908_v61 = vperm.slane %v722_v55, 0 }
  0x83   : > { %981 = vmatpush.bf16.msra.mxu2 %v2582_v0 }
  0x85   : > { %954 = vmatpush.bf16.msra.mxu0 %v2562_v6  ;;  %v813_v6 = vperm.slane %v810_v2, 2 }
  0x86   : > { %968 = vmatpush.bf16.msra.mxu1 %v2566_v10 }
  0xe7   : > { %v724_v12 = vpop.xlane.xlu0 %723 }
  0xe8   : > { %v734_v13 = vmul.f32 %v3829_v11, %v724_v12  ;;  %v2570_v12 = vor.u32 %v2957_v9, %v2569_v8  ;;  %v814_v9 = vperm.slane %v810_v2, 4 }
  0xea   : > { %v3833_v14 = vsub.f32 %v3823_v3, %v734_v13  ;;  %982 = vmatpush.bf16.msra.mxu2 %v2570_v12  ;;  %v2549_v13 = vld [vmem:[%s3758_s3 + $0x18] sm:$0xf]  ;;  %v812_v12 = vperm.slane %v810_v2, 0  ;;  %v2973_v2 = vld [vmem:[%s3765_s25] sm:$0xff] }
  0xec   : > { %v738_v15 = vmul.f32 %v3833_v14, %v3833_v14  ;;  %v818_v20 = vperm.slane %v812_v12, 0 }
  0xee   : > { %740 = vadd.xlane.f32.xlu1 %v738_v15  ;;  %v2953_v15 = vld [vmem:[%s3758_s3 + $0x20] sm:$0xf0]  ;;  %983 = vmatpush.bf16.msra.mxu2 %v2558_v23 }
  0xef   : > { %v726_v16 = vpop.xlane.xlu0 %725 }
  0xf0   : > { %v735_v17 = vmul.f32 %v3829_v11, %v726_v16  ;;  %v2952_v16 = vld [vmem:[%s3758_s3 + $0x1c] sm:$0xf] }
  0xf2   : > { %v3839_v18 = vsub.f32 %v3826_v4, %v735_v17  ;;  %v2550_v17 = vor.u32 %v2953_v15, %v2549_v13  ;;  %984 = vmatpush.bf16.msra.mxu2 %v2546_v34 }
  0xf4   : > { %v739_v19 = vmul.f32 %v3839_v18, %v3839_v18  ;;  %955 = vmatpush.bf16.msra.mxu0 %v2550_v17  ;;  %v820_v17 = vperm.slane %v814_v9, 0 }
  0xf6   : > { %742 = vadd.xlane.f32.xlu1 %v739_v19  ;;  %v2551_v19 = vld [vmem:[%s3758_s3 + $0x24] sm:$0xf0] }
  0xf7   : > { %v2554_v22 = vor.u32 %v2952_v16, %v2551_v19 }
  0xf8   : > { %956 = vmatpush.bf16.msra.mxu0 %v2538_v28 }
  0xf9   : > { %969 = vmatpush.bf16.msra.mxu1 %v2554_v22 }
  0xfd   : > { %970 = vmatpush.bf16.msra.mxu1 %v2542_v33 }
 0x161   : > { %v741_v27 = vpop.xlane.xlu1 %740 }
 0x162   : > { %v744_v32 = vmul.f32 %v741_v27, %v3829_v11 }
 0x164   : > { %v746_v35 = vadd.f32 1e-05, %v744_v32 }
 0x166   : > { %3189 = vrsqrt.f32 %v746_v35  ;;  %vm754_vm2 = vweird.f32 %v746_v35 }
 0x169   : > { %v743_v36 = vpop.xlane.xlu1 %742 }
 0x16a   : > { %v745_v37 = vmul.f32 %v743_v36, %v3829_v11 }
 0x16c   : > { %v3190_v38 = vpop.eup %3189  ;;  %v747_v39 = vadd.f32 1e-05, %v745_v37 }
 0x16d   : > { %v749_v40 = vmul.f32 %v3190_v38, %v746_v35  ;;  %vm755_vm1 = vweird.f32 %v3190_v38 }
 0x16e   : > { %3191 = vrsqrt.f32 %v747_v39  ;;  %vm756_vm3 = vmor %vm754_vm2, %vm755_vm1  ;;  %vm764_vm5 = vweird.f32 %v747_v39 }
 0x16f   : > { %v750_v41 = vmul.f32 %v3190_v38, %v749_v40 }
 0x171   : > { %v751_v42 = vmul.f32 0.5, %v750_v41 }
 0x173   : > { %v752_v43 = vsub.f32 1.5, %v751_v42 }
 0x174   : > { %v3192_v44 = vpop.eup %3191 }
 0x175   : > { %v753_v45 = vmul.f32 %v3190_v38, %v752_v43  ;;  %v759_v46 = vmul.f32 %v3192_v44, %v747_v39  ;;  %vm765_vm4 = vweird.f32 %v3192_v44 }
 0x176   : > { %vm766_vm6 = vmor %vm764_vm5, %vm765_vm4 }
 0x177   : > { %v760_v48 = vmul.f32 %v3192_v44, %v759_v46  ;;  %v757_v50 = vsel %vm756_vm3, %v3190_v38, %v753_v45 }
 0x178   : > { %v768_v54 = vmul.f32 %v757_v50, %v3833_v14 }
 0x179   : > { %v761_v51 = vmul.f32 0.5, %v760_v48 }
 0x17a   : > { %v771_v60 = vmul.f32 %v3904_v56, %v768_v54 }
 0x17b   : > { %v762_v53 = vsub.f32 1.5, %v761_v51 }
 0x17c   : > { %v774_v63 = vadd.f32 %v3908_v61, %v771_v60 }
 0x17d   : > { %v763_v57 = vmul.f32 %v3192_v44, %v762_v53 }
 0x17f   : > { %v767_v58 = vsel %vm766_vm6, %v3192_v44, %v763_v57 }
 0x180   : > { %v769_v59 = vmul.f32 %v767_v58, %v3839_v18  ;;  %v819_v18 = vperm.slane %v813_v6, 0 }
 0x182   : > { %v772_v62 = vmul.f32 %v3904_v56, %v769_v59 }
 0x184   : > { %v775_v14 = vadd.f32 %v3908_v61, %v772_v62 }
 0x186   : > { %v776_v0 = vpack.c.bf16 %v775_v14, %v774_v63 }
 0x188   : > { %957 = vmatmul.bf16.vlgmr.msra.gmra.mxu0 %v776_v0  ;;  %971 = vmatmul.bf16.vlgmr.msra.gmra.mxu1 %v776_v0 }
 0x189   : > { %985 = vmatmul.bf16.vlgmr.msra.gmra.mxu2 %v776_v0 }
 0x205   : > { %v972_v5 = vpop.f32.mrf.mxu1  ;;  %v958_v7 = vpop.f32.mrf.mxu0 }
 0x206   : > { %v973_v13 = vadd.f32 %v972_v5, %v819_v18  ;;  %v959_v26 = vadd.f32 %v958_v7, %v818_v20 }
 0x20c   : > { %v986_v8 = vpop.f32.mrf.mxu2 }
 0x20d   : > { %v974_v10 = vpop.f32.mrf.mxu1  ;;  %v960_v19 = vpop.f32.mrf.mxu0  ;;  %v987_v24 = vadd.f32 %v986_v8, %v820_v17 }
 0x20e   : > { %v975_v15 = vadd.f32 %v974_v10, %v819_v18  ;;  %v961_v22 = vadd.f32 %v960_v19, %v818_v20 }
 0x210   : > { %v3914_v16 = vpack.c.bf16 %v975_v15, %v973_v13  ;;  %v3922_v28 = vpack.c.bf16 %v961_v22, %v959_v26  ;;  %v2976_v15 = vld [vmem:[%s3765_s25 + $0x18] sm:$0xff] }
 0x211   : > { %1203 = vmatpush.bf16.msrb.mxu2 %v2976_v15 }
 0x212   : > { %1113 = vrot.lane.b32.xlu2 %v3914_v16, %s3524_s13  ;;  %v1017_v21 = vsel %vm1012_vm7, %v3914_v16, 0 }
 0x213   : > { %1026 = vmatpush.bf16.xpose.msra.mxu3 %v1017_v21 }
 0x214   : > { %v988_v23 = vpop.f32.mrf.mxu2 }
 0x215   : > { %v989_v25 = vadd.f32 %v988_v23, %v820_v17 }
 0x217   : > { %v3920_v27 = vpack.c.bf16 %v989_v25, %v987_v24 }
 0x21a   : > { %1110 = vrot.lane.b32.xlu2 %v3922_v28, %s3524_s13  ;;  %2631 = vmatmul.msk.bf16.vlgmr.msra.gmra.mxu3 %vm1012_vm7, %v3922_v28 }
 0x21b   : > { %1069 = vmatpush.bf16.msrb.mxu3 %v3920_v27 }
 0x21f   : > { %1098 = vmatpush.bf16.msra.mxu3 %v2974_v1 }
 0x223   : > { %1099 = vmatpush.bf16.msra.mxu3 %v2973_v2 }
 0x26c   : > { %v1114_v29 = vpop.permute.xlu2 %1113 }
 0x26d   : > { %v1119_v30 = vsel %vm1012_vm7, %v1114_v29, 0 }
 0x26e   : > { %1128 = vmatpush.bf16.xpose.msrb.mxu0 %v1119_v30 }
 0x274   : > { %v1111_v31 = vpop.permute.xlu2 %1110 }
 0x275   : > { %2642 = vmatmul.msk.bf16.vlgmr.msrb.gmra.mxu0 %vm1012_vm7, %v1111_v31 }
 0x29d   : > { %v1028_v32 = vpop.f32.mrf.mxu3 }
 0x29e   : > { %v1033_v33 = vmul.f32 0.17677669, %v1028_v32 }
 0x2a0   : > { %v1036_v34 = vsel %vm1035_vm8, %v1033_v33, -inf }
 0x2a1   : > { %1037 = vmax.xlane.f32.xlu0 %v1036_v34 }
 0x2a5   : > { %v1030_v35 = vpop.f32.mrf.mxu3 }
 0x2a6   : > { %v1034_v36 = vmul.f32 0.17677669, %v1030_v35 }
 0x2a8   : > { %v1039_v37 = vsel %vm1035_vm8, %v1034_v36, -inf }
 0x2a9   : > { %1040 = vmax.xlane.f32.xlu1 %v1039_v37 }
 0x2f2   : > { %v1130_v38 = vpop.f32.mrf.mxu0 }
 0x2f3   : > { %v1135_v39 = vmul.f32 0.17677669, %v1130_v38 }
 0x2f5   : > { %v1137_v40 = vsel %vm1035_vm8, %v1135_v39, -inf }
 0x2f6   : > { %1138 = vmax.xlane.f32.xlu2 %v1137_v40 }
 0x2fa   : > { %v1132_v41 = vpop.f32.mrf.mxu0 }
 0x2fb   : > { %v1136_v42 = vmul.f32 0.17677669, %v1132_v41 }
 0x2fd   : > { %v1140_v43 = vsel %vm1035_vm8, %v1136_v42, -inf }
 0x2fe   : > { %1141 = vmax.xlane.f32.xlu0 %v1140_v43 }
 0x30e   : > { %1215 = vrot.lane.b32.xlu2 %v3914_v16, %s3525_s26 }
 0x314   : > { %v1038_v44 = vpop.xlane.xlu0 %1037 }
 0x315   : > { %v1042_v45 = vsub.f32 %v1033_v33, %v1038_v44 }
 0x317   : > { %v1044_v46 = vmul.f32 1.442695, %v1042_v45 }
 0x319   : > { %3193 = vpow2.f32 %v1044_v46 }
 0x31c   : > { %v1041_v47 = vpop.xlane.xlu1 %1040 }
 0x31d   : > { %v1043_v48 = vsub.f32 %v1034_v36, %v1041_v47 }
 0x31f   : > { %v3194_v49 = vpop.eup %3193  ;;  %v1046_v50 = vmul.f32 1.442695, %v1043_v48 }
 0x320   : > { %v1048_v51 = vsel %vm1035_vm8, %v3194_v49, 0.0 }
 0x321   : > { %3195 = vpow2.f32 %v1046_v50  ;;  %1049 = vadd.xlane.f32.xlu1 %v1048_v51 }
 0x327   : > { %v3196_v52 = vpop.eup %3195 }
 0x328   : > { %v1051_v53 = vsel %vm1035_vm8, %v3196_v52, 0.0 }
 0x329   : > { %1052 = vadd.xlane.f32.xlu0 %v1051_v53 }
 0x369   : > { %v1139_v54 = vpop.xlane.xlu2 %1138 }
 0x36a   : > { %v1143_v55 = vsub.f32 %v1135_v39, %v1139_v54 }
 0x36c   : > { %v1145_v57 = vmul.f32 1.442695, %v1143_v55 }
 0x36e   : > { %3197 = vpow2.f32 %v1145_v57 }
 0x371   : > { %v1142_v58 = vpop.xlane.xlu0 %1141  ;;  %v1216_v10 = vpop.permute.xlu2 %1215 }
 0x372   : > { %v1144_v59 = vsub.f32 %v1136_v42, %v1142_v58  ;;  %v1221_v13 = vsel %vm1012_vm7, %v1216_v10, 0  ;;  %v1007_v42 = vld [vmem:[%s698_s7] sm:$0x1] }
 0x373   : > { %v1008_v43 = vunpack.c.l.bf16 %v1007_v42 }
 0x374   : > { %v3198_v60 = vpop.eup %3197  ;;  %v1147_v62 = vmul.f32 1.442695, %v1144_v59 }
 0x375   : > { %v1149_v63 = vsel %vm1035_vm8, %v3198_v60, 0.0  ;;  %v1106_v44 = vperm.slane %v1008_v43, 0 }
 0x376   : > { %3199 = vpow2.f32 %v1147_v62  ;;  %1150 = vadd.xlane.f32.xlu1 %v1149_v63 }
 0x37c   : > { %v3200_v14 = vpop.eup %3199 }
 0x37d   : > { %v1152_v0 = vsel %vm1035_vm8, %v3200_v14, 0.0 }
 0x37e   : > { %1153 = vadd.xlane.f32.xlu0 %v1152_v0 }
 0x38f   : > { %1161 = vrot.lane.b32.xlu1 %v3920_v27, %s3524_s13 }
 0x392   : > { %1316 = vrot.lane.b32.xlu0 %v3914_v16, %s3526_s23  ;;  %v2975_v16 = vld [vmem:[%s3765_s25 + $0x10] sm:$0xff] }
 0x393   : > { %1204 = vmatpush.bf16.msrb.mxu2 %v2975_v16 }
 0x394   : > { %v1050_v5 = vpop.xlane.xlu1 %1049 }
 0x395   : > { %3201 = vrcp.f32 %v1050_v5 }
 0x397   : > { %1314 = vrot.lane.b32.xlu1 %v3922_v28, %s3526_s23 }
 0x39a   : > { %1213 = vrot.lane.b32.xlu0 %v3922_v28, %s3525_s26 }
 0x39b   : > { %v3202_v7 = vpop.eup %3201 }
 0x39c   : > { %v1053_v6 = vpop.xlane.xlu0 %1052  ;;  %v1056_v8 = vmul.f32 %v3202_v7, %v3194_v49 }
 0x39d   : > { %3203 = vrcp.f32 %v1053_v6 }
 0x3a3   : > { %v3204_v18 = vpop.eup %3203 }
 0x3a4   : > { %v1057_v9 = vmul.f32 %v3204_v18, %v3196_v52 }
 0x3a6   : > { %v1058_v12 = vpack.c.bf16 %v1057_v9, %v1056_v8 }
 0x3a8   : > { %2632 = vmatmul.msk.bf16.vlgmr.msrb.gmra.mxu3 %vm1035_vm8, %v1058_v12 }
 0x3a9   : > { %1230 = vmatpush.bf16.xpose.msrb.mxu3 %v1221_v13 }
 0x3e9   : > { %v1151_v19 = vpop.xlane.xlu1 %1150 }
 0x3f1   : > { %v1154_v17 = vpop.xlane.xlu0 %1153 }
 0x3f2   : > { %3205 = vrcp.f32 %v1154_v17 }
 0x3f3   : > { %3207 = vrcp.f32 %v1151_v19 }
 0x3f8   : > { %v3206_v20 = vpop.eup %3205 }
 0x3f9   : > { %v3208_v21 = vpop.eup %3207  ;;  %v1158_v22 = vmul.f32 %v3206_v20, %v3200_v14 }
 0x3fa   : > { %v1157_v23 = vmul.f32 %v3208_v21, %v3198_v60 }
 0x3fc   : > { %v1159_v25 = vpack.c.bf16 %v1158_v22, %v1157_v23 }
 0x401   : > { %v1162_v24 = vpop.permute.xlu1 %1161 }
 0x402   : > { %1174 = vmatpush.bf16.msrb.mxu1 %v1162_v24 }
 0x404   : > { %v1317_v26 = vpop.permute.xlu0 %1316 }
 0x405   : > { %v1322_v28 = vsel %vm1012_vm7, %v1317_v26, 0  ;;  %2643 = vmatmul.msk.bf16.vlgmr.msrb.gmra.mxu1 %vm1035_vm8, %v1159_v25 }
 0x406   : > { %1331 = vmatpush.bf16.xpose.msra.mxu2 %v1322_v28 }
 0x409   : > { %v1315_v36 = vpop.permute.xlu1 %1314 }
 0x40c   : > { %v1214_v32 = vpop.permute.xlu0 %1213 }
 0x42b   : > { %v1071_v29 = vpop.f32.mrf.mxu3 }
 0x433   : > { %v1073_v30 = vpop.f32.mrf.mxu3 }
 0x434   : > { %v1076_v31 = vpack.c.bf16 %v1073_v30, %v1071_v29 }
 0x436   : > { %2641 = vmatmul.msk.bf16.vlgmr.msra.gmra.mxu3 %vm1012_vm7, %v1076_v31 }
 0x446   : > { %2653 = vmatmul.msk.bf16.vlgmr.msrb.gmra.mxu3 %vm1012_vm7, %v1214_v32 }
 0x482   : > { %v1176_v33 = vpop.f32.mrf.mxu1 }
 0x48a   : > { %v1178_v34 = vpop.f32.mrf.mxu1 }
 0x48b   : > { %v1181_v35 = vpack.c.bf16 %v1178_v34, %v1176_v33 }
 0x48d   : > { %2652 = vmatmul.msk.bf16.vlgmr.msrb.gmra.mxu2 %vm1012_vm7, %v1181_v35 }
 0x49d   : > { %2664 = vmatmul.msk.bf16.vlgmr.msra.gmra.mxu2 %vm1012_vm7, %v1315_v36 }
 0x4b9   : > { %v1101_v37 = vpop.f32.mrf.mxu3 }
 0x4ba   : > { %v1107_v45 = vadd.f32 %v1106_v44, %v1101_v37  ;;  %v2978_v37 = vld [vmem:[%s3765_s25 + $0x28] sm:$0xff] }
 0x4bb   : > { %1304 = vmatpush.bf16.msra.mxu1 %v2978_v37  ;;  %v3002_v37 = vld [vmem:[%s3771_s30 + $0xac] sm:$0xf] }
 0x4c1   : > { %v1103_v38 = vpop.f32.mrf.mxu3 }
 0x4c2   : > { %v1108_v48 = vadd.f32 %v1106_v44, %v1103_v38  ;;  %v2977_v38 = vld [vmem:[%s3765_s25 + $0x20] sm:$0xff] }
 0x4c3   : > { %1305 = vmatpush.bf16.msra.mxu1 %v2977_v38  ;;  %v2767_v38 = vld [vmem:[%s3771_s30 + $0xb8] sm:$0xf0] }
 0x4c9   : > { %v1232_v39 = vpop.f32.mrf.mxu3 }
 0x4ca   : > { %v1237_v40 = vmul.f32 0.17677669, %v1232_v39  ;;  %v2980_v39 = vld [vmem:[%s3765_s25 + $0x38] sm:$0xff] }
 0x4cc   : > { %v1239_v41 = vsel %vm1035_vm8, %v1237_v40, -inf }
 0x4cd   : > { %1240 = vmax.xlane.f32.xlu2 %v1239_v41 }
 0x4d1   : > { %v1234_v54 = vpop.f32.mrf.mxu3 }
 0x4d2   : > { %v1238_v55 = vmul.f32 0.17677669, %v1234_v54 }
 0x4d4   : > { %v1242_v59 = vsel %vm1035_vm8, %v1238_v55, -inf }
 0x510   : > { %v1206_v46 = vpop.f32.mrf.mxu2 }
 0x511   : > { %v3967_v47 = vadd.f32 %v1206_v46, %v1107_v45 }
 0x518   : > { %v1208_v49 = vpop.f32.mrf.mxu2 }
 0x519   : > { %v3969_v50 = vadd.f32 %v1208_v49, %v1108_v48 }
 0x520   : > { %v1333_v51 = vpop.f32.mrf.mxu2 }
 0x521   : > { %v1338_v52 = vmul.f32 0.17677669, %v1333_v51 }
 0x523   : > { %v1340_v53 = vsel %vm1035_vm8, %v1338_v52, -inf }
 0x524   : > { %1341 = vmax.xlane.f32.xlu1 %v1340_v53 }
 0x528   : > { %v1335_v57 = vpop.f32.mrf.mxu2 }
 0x529   : > { %v1339_v58 = vmul.f32 0.17677669, %v1335_v57 }
 0x52b   : > { %v1343_v60 = vsel %vm1035_vm8, %v1339_v58, -inf }
 0x52c   : > { %1243 = vmax.xlane.f32.xlu1 %v1242_v59  ;;  %1344 = vmax.xlane.f32.xlu0 %v1343_v60 }
 0x540   : > { %v1241_v62 = vpop.xlane.xlu2 %1240 }
 0x541   : > { %v1245_v63 = vsub.f32 %v1237_v40, %v1241_v62  ;;  %v2979_v40 = vld [vmem:[%s3765_s25 + $0x30] sm:$0xff] }
 0x543   : > { %v1247_v14 = vmul.f32 1.442695, %v1245_v63 }
 0x545   : > { %3209 = vpow2.f32 %v1247_v14 }
 0x54b   : > { %v3210_v0 = vpop.eup %3209 }
 0x54c   : > { %v1251_v1 = vsel %vm1035_vm8, %v3210_v0, 0.0 }
 0x54d   : > { %1252 = vadd.xlane.f32.xlu1 %v1251_v1  ;;  %v3011_v1 = vld [vmem:[%s3771_s30 + $0xec] sm:$0xf0] }
 0x566   : > { %1262 = vrot.lane.b32.xlu1 %v3920_v27, %s3525_s26 }
 0x597   : > { %v1342_v2 = vpop.xlane.xlu1 %1341 }
 0x598   : > { %v1346_v5 = vsub.f32 %v1338_v52, %v1342_v2  ;;  %v3009_v2 = vld [vmem:[%s3771_s30 + $0xe4] sm:$0xf] }
 0x59a   : > { %v1348_v6 = vmul.f32 1.442695, %v1346_v5 }
 0x59c   : > { %3211 = vpow2.f32 %v1348_v6  ;;  %v2791_v6 = vld [vmem:[%s3771_s30 + $0xf0] sm:$0xf0] }
 0x59f   : > { %v1244_v7 = vpop.xlane.xlu1 %1243  ;;  %v1345_v18 = vpop.xlane.xlu0 %1344 }
 0x5a0   : > { %v1246_v8 = vsub.f32 %v1238_v55, %v1244_v7  ;;  %v1347_v9 = vsub.f32 %v1339_v58, %v1345_v18  ;;  %v2797_v7 = vld [vmem:[%s3771_s30 + $0xe8] sm:$0xf]  ;;  %v3012_v18 = vld [vmem:[%s3771_s30 + $0xf4] sm:$0xf0] }
 0x5a2   : > { %v3212_v10 = vpop.eup %3211  ;;  %v1249_v12 = vmul.f32 1.442695, %v1246_v8  ;;  %v1350_v13 = vmul.f32 1.442695, %v1347_v9  ;;  %v2794_v8 = vor.u32 %v3009_v2, %v2791_v6  ;;  %v2798_v9 = vor.u32 %v3012_v18, %v2797_v7  ;;  %v2991_v6 = vld [vmem:[%s3771_s30 + $0x4c] sm:$0xf0] }
 0x5a3   : > { %v1352_v15 = vsel %vm1035_vm8, %v3212_v10, 0.0  ;;  %v2989_v7 = vld [vmem:[%s3771_s30 + $0x44] sm:$0xf] }
 0x5a4   : > { %3213 = vpow2.f32 %v1249_v12  ;;  %1353 = vadd.xlane.f32.xlu0 %v1352_v15  ;;  %v2799_v12 = vld [vmem:[%s3771_s30 + $0xf8] sm:$0xf0]  ;;  %1683 = vmatpush.bf16.msrb.mxu2 %v2794_v8  ;;  %v2773_v15 = vld [vmem:[%s3771_s30 + $0xc0] sm:$0xf]  ;;  %v2711_v8 = vld [vmem:[%s3771_s30 + $0x50] sm:$0xf0] }
 0x5a5   : > { %3215 = vpow2.f32 %v1350_v13 }
 0x5aa   : > { %v3214_v16 = vpop.eup %3213 }
 0x5ab   : > { %v3216_v17 = vpop.eup %3215  ;;  %v1254_v19 = vsel %vm1035_vm8, %v3214_v16, 0.0 }
 0x5ac   : > { %1255 = vadd.xlane.f32.xlu0 %v1254_v19  ;;  %v1355_v20 = vsel %vm1035_vm8, %v3216_v17, 0.0 }
 0x5ad   : > { %1356 = vadd.xlane.f32.xlu2 %v1355_v20  ;;  %v2775_v20 = vld [vmem:[%s3771_s30 + $0xd0] sm:$0xf0] }
 0x5c0   : > { %v1253_v21 = vpop.xlane.xlu1 %1252 }
 0x5c1   : > { %3217 = vrcp.f32 %v1253_v21  ;;  %v2781_v21 = vld [vmem:[%s3771_s30 + $0xc8] sm:$0xf] }
 0x5c5   : > { %1363 = vrot.lane.b32.xlu2 %v3920_v27, %s3526_s23 }
 0x5c7   : > { %v3218_v26 = vpop.eup %3217 }
 0x5c8   : > { %v1259_v31 = vmul.f32 %v3218_v26, %v3210_v0  ;;  %v2789_v0 = vld [vmem:[%s3771_s30 + $0xe0] sm:$0xf]  ;;  %v2783_v26 = vld [vmem:[%s3771_s30 + $0xd8] sm:$0xf0] }
 0x5c9   : > { %v2790_v5 = vor.u32 %v3011_v1, %v2789_v0  ;;  %v2994_v0 = vld [vmem:[%s3771_s30 + $0x6c] sm:$0xf]  ;;  %v2735_v1 = vld [vmem:[%s3771_s30 + $0x78] sm:$0xf0] }
 0x5ca   : > { %v2738_v2 = vor.u32 %v2994_v0, %v2735_v1 }
 0x5cb   : > { %1669 = vmatpush.bf16.msrb.mxu1 %v2790_v5  ;;  %v2709_v5 = vld [vmem:[%s3771_s30 + $0x40] sm:$0xf] }
 0x5cc   : > { %v2710_v18 = vor.u32 %v2991_v6, %v2709_v5 }
 0x5d8   : > { %v1263_v22 = vpop.permute.xlu1 %1262 }
 0x5d9   : > { %1275 = vmatpush.bf16.msra.mxu0 %v1263_v22  ;;  %v3008_v22 = vld [vmem:[%s3771_s30 + $0xd4] sm:$0xf0] }
 0x5dd   : > { %1405 = vmatpush.bf16.msrb.mxu0 %v2980_v39  ;;  %v2770_v39 = vor.u32 %v3002_v37, %v2767_v38 }
 0x5e1   : > { %1406 = vmatpush.bf16.msrb.mxu0 %v2979_v40  ;;  %v2741_v40 = vld [vmem:[%s3771_s30 + $0x80] sm:$0xf] }
 0x617   : > { %v1354_v23 = vpop.xlane.xlu0 %1353 }
 0x618   : > { %3219 = vrcp.f32 %v1354_v23 }
 0x61e   : > { %v3220_v28 = vpop.eup %3219 }
 0x61f   : > { %v1256_v24 = vpop.xlane.xlu0 %1255  ;;  %v1360_v32 = vmul.f32 %v3220_v28, %v3212_v10  ;;  %v3010_v10 = vld [vmem:[%s3771_s30 + $0xec] sm:$0xf] }
 0x620   : > { %v1357_v25 = vpop.xlane.xlu2 %1356  ;;  %3221 = vrcp.f32 %v1256_v24  ;;  %v2802_v13 = vor.u32 %v3010_v10, %v2799_v12  ;;  %v2782_v24 = vor.u32 %v3008_v22, %v2781_v21  ;;  %v2992_v10 = vld [vmem:[%s3771_s30 + $0x54] sm:$0xf0]  ;;  %v2714_v12 = vor.u32 %v2989_v7, %v2711_v8  ;;  %v2985_v21 = vld [vmem:[%s3771_s30 + $0x24] sm:$0xf] }
 0x621   : > { %3223 = vrcp.f32 %v1357_v25  ;;  %v3006_v25 = vld [vmem:[%s3771_s30 + $0xcc] sm:$0xf] }
 0x622   : > { %v2786_v28 = vor.u32 %v3006_v25, %v2783_v26  ;;  %v2988_v25 = vld [vmem:[%s3771_s30 + $0x34] sm:$0xf0] }
 0x626   : > { %v3222_v29 = vpop.eup %3221 }
 0x627   : > { %v3224_v30 = vpop.eup %3223  ;;  %v1260_v27 = vmul.f32 %v3222_v29, %v3214_v16  ;;  %v3007_v16 = vld [vmem:[%s3771_s30 + $0xcc] sm:$0xf0]  ;;  %v2757_v29 = vld [vmem:[%s3771_s30 + $0xa0] sm:$0xf] }
 0x628   : > { %v1361_v33 = vmul.f32 %v3224_v30, %v3216_v17  ;;  %v1364_v34 = vpop.permute.xlu2 %1363  ;;  %v3005_v17 = vld [vmem:[%s3771_s30 + $0xc4] sm:$0xf]  ;;  %v2774_v19 = vor.u32 %v3007_v16, %v2773_v15  ;;  %v3003_v30 = vld [vmem:[%s3771_s30 + $0xac] sm:$0xf0]  ;;  %v2990_v15 = vld [vmem:[%s3771_s30 + $0x4c] sm:$0xf] }
 0x629   : > { %v1261_v35 = vpack.c.bf16 %v1260_v27, %v1259_v31  ;;  %1376 = vmatpush.bf16.msra.mxu3 %v1364_v34  ;;  %v2778_v23 = vor.u32 %v3005_v17, %v2775_v20  ;;  %v3001_v31 = vld [vmem:[%s3771_s30 + $0xa4] sm:$0xf]  ;;  %v2758_v27 = vor.u32 %v3003_v30, %v2757_v29  ;;  %v3004_v34 = vld [vmem:[%s3771_s30 + $0xb4] sm:$0xf0]  ;;  %v2719_v16 = vld [vmem:[%s3771_s30 + $0x58] sm:$0xf0] }
 0x62a   : > { %v1362_v36 = vpack.c.bf16 %v1361_v33, %v1360_v32  ;;  %1670 = vmatpush.bf16.msrb.mxu1 %v2774_v19  ;;  %v2759_v32 = vld [vmem:[%s3771_s30 + $0xb0] sm:$0xf0]  ;;  %v2765_v33 = vld [vmem:[%s3771_s30 + $0xa8] sm:$0xf]  ;;  %v2722_v17 = vor.u32 %v2990_v15, %v2719_v16  ;;  %v2693_v19 = vld [vmem:[%s3771_s30 + $0x20] sm:$0xf] }
 0x62b   : > { %2654 = vmatmul.msk.bf16.vlgmr.msra.gmra.mxu0 %vm1035_vm8, %v1261_v35  ;;  %1684 = vmatpush.bf16.msrb.mxu2 %v2778_v23  ;;  %v2762_v35 = vor.u32 %v3001_v31, %v2759_v32  ;;  %v2987_v20 = vld [vmem:[%s3771_s30 + $0x2c] sm:$0xf0]  ;;  %v2695_v23 = vld [vmem:[%s3771_s30 + $0x30] sm:$0xf0]  ;;  %v2986_v29 = vld [vmem:[%s3771_s30 + $0x2c] sm:$0xf] }
 0x62c   : > { %2665 = vmatmul.msk.bf16.vlgmr.msra.gmra.mxu3 %vm1035_vm8, %v1362_v36  ;;  %1711 = vmatpush.bf16.msra.mxu0 %v2802_v13  ;;  %v2766_v36 = vor.u32 %v3004_v34, %v2765_v33  ;;  %v2694_v22 = vor.u32 %v2987_v20, %v2693_v19  ;;  %v2698_v26 = vor.u32 %v2985_v21, %v2695_v23  ;;  %v2703_v30 = vld [vmem:[%s3771_s30 + $0x38] sm:$0xf0]  ;;  %v2677_v31 = vld [vmem:[%s3771_s30] sm:$0xf]  ;;  %v2983_v33 = vld [vmem:[%s3771_s30 + $0xc] sm:$0xf0] }
 0x62d   : > { %1697 = vmatpush.bf16.msrb.mxu3 %v2798_v9  ;;  %v2717_v9 = vld [vmem:[%s3771_s30 + $0x48] sm:$0xf]  ;;  %v2706_v32 = vor.u32 %v2986_v29, %v2703_v30  ;;  %v2981_v34 = vld [vmem:[%s3771_s30 + $0x4] sm:$0xf]  ;;  %v2678_v37 = vor.u32 %v2983_v33, %v2677_v31  ;;  %v3028_v31 = vld [vmem:[%s3773_s24 + $0x78] sm:$0xff] }
 0x62e   : > { %1671 = vmatpush.bf16.msrb.mxu1 %v2758_v27  ;;  %v2718_v13 = vor.u32 %v2992_v10, %v2717_v9 }
 0x62f   : > { %1685 = vmatpush.bf16.msrb.mxu2 %v2762_v35  ;;  %v2679_v35 = vld [vmem:[%s3771_s30 + $0x10] sm:$0xf0] }
 0x630   : > { %1712 = vmatpush.bf16.msra.mxu0 %v2786_v28  ;;  %v2682_v38 = vor.u32 %v2981_v34, %v2679_v35 }
 0x631   : > { %1698 = vmatpush.bf16.msrb.mxu3 %v2782_v24  ;;  %v2701_v24 = vld [vmem:[%s3771_s30 + $0x28] sm:$0xf] }
 0x632   : > { %v2702_v28 = vor.u32 %v2988_v25, %v2701_v24  ;;  %v3019_v25 = vld [vmem:[%s3773_s24 + $0x30] sm:$0xff] }
 0x634   : > { %1713 = vmatpush.bf16.msra.mxu0 %v2770_v39  ;;  %v2685_v39 = vld [vmem:[%s3771_s30 + $0x8] sm:$0xf] }
 0x635   : > { %1699 = vmatpush.bf16.msrb.mxu3 %v2766_v36 }
 0x6a8   : > { %v1277_v41 = vpop.f32.mrf.mxu0 }
 0x6af   : > { %v1378_v42 = vpop.f32.mrf.mxu3 }
 0x6b0   : > { %v1279_v43 = vpop.f32.mrf.mxu0 }
 0x6b1   : > { %v1282_v44 = vpack.c.bf16 %v1279_v43, %v1277_v41  ;;  %v2999_v41 = vld [vmem:[%s3771_s30 + $0x8c] sm:$0xf0] }
 0x6b2   : > { %v2742_v43 = vor.u32 %v2999_v41, %v2741_v40  ;;  %v2984_v40 = vld [vmem:[%s3771_s30 + $0x14] sm:$0xf0]  ;;  %v2982_v41 = vld [vmem:[%s3771_s30 + $0xc] sm:$0xf] }
 0x6b3   : > { %2663 = vmatmul.msk.bf16.vlgmr.msra.gmra.mxu1 %vm1012_vm7, %v1282_v44  ;;  %v2743_v44 = vld [vmem:[%s3771_s30 + $0x90] sm:$0xf0] }
 0x6b4   : > { %1672 = vmatpush.bf16.msrb.mxu1 %v2742_v43  ;;  %v2687_v43 = vld [vmem:[%s3771_s30 + $0x18] sm:$0xf0] }
 0x6b7   : > { %v1380_v45 = vpop.f32.mrf.mxu3 }
 0x6b8   : > { %v1383_v46 = vpack.c.bf16 %v1380_v45, %v1378_v42  ;;  %v2997_v42 = vld [vmem:[%s3771_s30 + $0x84] sm:$0xf]  ;;  %v2749_v45 = vld [vmem:[%s3771_s30 + $0x88] sm:$0xf] }
 0x6ba   : > { %2674 = vmatmul.msk.bf16.vlgmr.msrb.gmra.mxu0 %vm1012_vm7, %v1383_v46  ;;  %v3000_v46 = vld [vmem:[%s3771_s30 + $0x94] sm:$0xf0] }
 0x730   : > { %v1307_v48 = vpop.f32.mrf.mxu1 }
 0x731   : > { %v1312_v49 = vadd.f32 %v1307_v48, %v3967_v47  ;;  %v2746_v48 = vor.u32 %v2997_v42, %v2743_v44  ;;  %v2686_v42 = vor.u32 %v2984_v40, %v2685_v39 }
 0x733   : > { %1686 = vmatpush.bf16.msrb.mxu2 %v2746_v48 }
 0x737   : > { %v1408_v51 = vpop.f32.mrf.mxu0 }
 0x738   : > { %v1413_v52 = vadd.f32 %v1408_v51, %v1312_v49  ;;  %v1309_v54 = vpop.f32.mrf.mxu1  ;;  %v2750_v49 = vor.u32 %v3000_v46, %v2749_v45  ;;  %v2998_v51 = vld [vmem:[%s3771_s30 + $0x8c] sm:$0xf]  ;;  %v2690_v45 = vor.u32 %v2982_v41, %v2687_v43  ;;  %v3027_v43 = vld [vmem:[%s3773_s24 + $0x70] sm:$0xff] }
 0x739   : > { %v1313_v55 = vadd.f32 %v1309_v54, %v3969_v50 }
 0x73a   : > { %v3992_v53 = vadd.f32 %v1413_v52, %v3823_v3  ;;  %v2751_v52 = vld [vmem:[%s3771_s30 + $0x98] sm:$0xf0]  ;;  %1700 = vmatpush.bf16.msrb.mxu3 %v2750_v49 }
 0x73b   : > { %v2754_v54 = vor.u32 %v2998_v51, %v2751_v52 }
 0x73c   : > { %1417 = vadd.xlane.f32.xlu0 %v3992_v53 }
 0x73d   : > { %1714 = vmatpush.bf16.msra.mxu0 %v2754_v54 }
 0x73f   : > { %v1410_v57 = vpop.f32.mrf.mxu0 }
 0x740   : > { %v1414_v58 = vadd.f32 %v1410_v57, %v1313_v55  ;;  %v2725_v55 = vld [vmem:[%s3771_s30 + $0x60] sm:$0xf]  ;;  %v2995_v57 = vld [vmem:[%s3771_s30 + $0x6c] sm:$0xf0] }
 0x741   : > { %1715 = vmatpush.bf16.msra.mxu0 %v2738_v2 }
 0x742   : > { %v3997_v59 = vadd.f32 %v1414_v58, %v3826_v4  ;;  %v2993_v58 = vld [vmem:[%s3771_s30 + $0x64] sm:$0xf] }
 0x744   : > { %1419 = vadd.xlane.f32.xlu0 %v3997_v59 }
 0x745   : > { %1716 = vmatpush.bf16.msra.mxu0 %v2722_v17  ;;  %v3044_v17 = vld [vmem:[%s3773_s24 + $0xf8] sm:$0xff] }
 0x749   : > { %1717 = vmatpush.bf16.msra.mxu0 %v2706_v32 }
 0x74d   : > { %1718 = vmatpush.bf16.msra.mxu0 %v2690_v45 }
 0x751   : > { %2198 = vmatpush.bf16.msrb.mxu0 %v3044_v17 }
 0x7af   : > { %v1418_v47 = vpop.xlane.xlu0 %1417 }
 0x7b0   : > { %v1421_v3 = vmul.f32 %v1418_v47, %v3829_v11  ;;  %v2726_v47 = vor.u32 %v2995_v57, %v2725_v55 }
 0x7b2   : > { %v4002_v60 = vsub.f32 %v3992_v53, %v1421_v3  ;;  %v2727_v3 = vld [vmem:[%s3771_s30 + $0x70] sm:$0xf0]  ;;  %1673 = vmatpush.bf16.msrb.mxu1 %v2726_v47 }
 0x7b4   : > { %v1425_v50 = vmul.f32 %v4002_v60, %v4002_v60 }
 0x7b6   : > { %1427 = vadd.xlane.f32.xlu0 %v1425_v50  ;;  %v2733_v50 = vld [vmem:[%s3771_s30 + $0x68] sm:$0xf]  ;;  %1674 = vmatpush.bf16.msrb.mxu1 %v2710_v18 }
 0x7b7   : > { %v1420_v62 = vpop.xlane.xlu0 %1419 }
 0x7b8   : > { %v1422_v4 = vmul.f32 %v1420_v62, %v3829_v11  ;;  %v2996_v62 = vld [vmem:[%s3771_s30 + $0x74] sm:$0xf0] }
 0x7ba   : > { %v4008_v63 = vsub.f32 %v3997_v59, %v1422_v4  ;;  %v2730_v4 = vor.u32 %v2993_v58, %v2727_v3  ;;  %1675 = vmatpush.bf16.msrb.mxu1 %v2694_v22 }
 0x7bc   : > { %v1426_v14 = vmul.f32 %v4008_v63, %v4008_v63  ;;  %1687 = vmatpush.bf16.msrb.mxu2 %v2730_v4 }
 0x7be   : > { %1429 = vadd.xlane.f32.xlu2 %v1426_v14  ;;  %v2734_v14 = vor.u32 %v2996_v62, %v2733_v50  ;;  %1676 = vmatpush.bf16.msrb.mxu1 %v2678_v37  ;;  %v3042_v37 = vld [vmem:[%s3773_s24 + $0xe8] sm:$0xff] }
 0x7c0   : > { %1701 = vmatpush.bf16.msrb.mxu3 %v2734_v14  ;;  %1688 = vmatpush.bf16.msrb.mxu2 %v2714_v12 }
 0x7c4   : > { %1702 = vmatpush.bf16.msrb.mxu3 %v2718_v13  ;;  %1689 = vmatpush.bf16.msrb.mxu2 %v2698_v26  ;;  %v3043_v26 = vld [vmem:[%s3773_s24 + $0xf0] sm:$0xff] }
 0x7c5   : > { %2199 = vmatpush.bf16.msrb.mxu0 %v3043_v26 }
 0x7c8   : > { %1703 = vmatpush.bf16.msrb.mxu3 %v2702_v28  ;;  %1690 = vmatpush.bf16.msrb.mxu2 %v2682_v38 }
 0x7c9   : > { %2200 = vmatpush.bf16.msrb.mxu0 %v3042_v37 }
 0x7cc   : > { %1704 = vmatpush.bf16.msrb.mxu3 %v2686_v42  ;;  %2170 = vmatpush.bf16.msra.mxu2 %v3028_v31 }
 0x7d0   : > { %2171 = vmatpush.bf16.msra.mxu2 %v3027_v43  ;;  %v3022_v43 = vld [vmem:[%s3773_s24 + $0x48] sm:$0xff] }
 0x829   : > { %v1428_v27 = vpop.xlane.xlu0 %1427 }
 0x82a   : > { %v1431_v36 = vmul.f32 %v1428_v27, %v3829_v11  ;;  %v3036_v27 = vld [vmem:[%s3773_s24 + $0xb8] sm:$0xff] }
 0x82b   : > { %2184 = vmatpush.bf16.msra.mxu3 %v3036_v27  ;;  %v3031_v27 = vld [vmem:[%s3773_s24 + $0x90] sm:$0xff] }
 0x82c   : > { %v1433_v44 = vadd.f32 1e-05, %v1431_v36  ;;  %v3018_v36 = vld [vmem:[%s3773_s24 + $0x28] sm:$0xff] }
 0x82e   : > { %3225 = vrsqrt.f32 %v1433_v44  ;;  %vm1441_vm10 = vweird.f32 %v1433_v44 }
 0x831   : > { %v1430_v46 = vpop.xlane.xlu2 %1429 }
 0x832   : > { %v1432_v48 = vmul.f32 %v1430_v46, %v3829_v11 }
 0x834   : > { %v3226_v49 = vpop.eup %3225  ;;  %v1434_v51 = vadd.f32 1e-05, %v1432_v48 }
 0x835   : > { %v1436_v52 = vmul.f32 %v3226_v49, %v1433_v44  ;;  %vm1442_vm9 = vweird.f32 %v3226_v49  ;;  %v3035_v44 = vld [vmem:[%s3773_s24 + $0xb0] sm:$0xff] }
 0x836   : > { %3227 = vrsqrt.f32 %v1434_v51  ;;  %vm1443_vm11 = vmor %vm1441_vm10, %vm1442_vm9  ;;  %vm1451_vm13 = vweird.f32 %v1434_v51  ;;  %2185 = vmatpush.bf16.msra.mxu3 %v3035_v44  ;;  %v3030_v44 = vld [vmem:[%s3773_s24 + $0x88] sm:$0xff] }
 0x837   : > { %v1437_v54 = vmul.f32 %v3226_v49, %v1436_v52  ;;  %v3041_v52 = vld [vmem:[%s3773_s24 + $0xe0] sm:$0xff] }
 0x838   : > { %2201 = vmatpush.bf16.msrb.mxu0 %v3041_v52 }
 0x839   : > { %v1438_v55 = vmul.f32 0.5, %v1437_v54 }
 0x83b   : > { %v1439_v57 = vsub.f32 1.5, %v1438_v55 }
 0x83c   : > { %v3228_v58 = vpop.eup %3227 }
 0x83d   : > { %v1440_v47 = vmul.f32 %v3226_v49, %v1439_v57  ;;  %v1446_v3 = vmul.f32 %v3228_v58, %v1434_v51  ;;  %vm1452_vm12 = vweird.f32 %v3228_v58  ;;  %v3017_v51 = vld [vmem:[%s3773_s24 + $0x20] sm:$0xff] }
 0x83e   : > { %vm1453_vm14 = vmor %vm1451_vm13, %vm1452_vm12 }
 0x83f   : > { %v1447_v50 = vmul.f32 %v3228_v58, %v1446_v3  ;;  %v1444_v62 = vsel %vm1443_vm11, %v3226_v49, %v1440_v47  ;;  %v3034_v47 = vld [vmem:[%s3773_s24 + $0xa8] sm:$0xff] }
 0x840   : > { %v1455_v0 = vmul.f32 %v1444_v62, %v4002_v60  ;;  %v1494_v60 = vld [vmem:[%s3815_s2] sm:$0xf]  ;;  %2186 = vmatpush.bf16.msra.mxu3 %v3034_v47  ;;  %v3021_v47 = vld [vmem:[%s3773_s24 + $0x40] sm:$0xff] }
 0x841   : > { %v1448_v4 = vmul.f32 0.5, %v1447_v50  ;;  %v1495_v10 = vunpack.c.l.bf16 %v1494_v60  ;;  %v3039_v60 = vld [vmem:[%s3773_s24 + $0xd0] sm:$0xff] }
 0x842   : > { %v1457_v6 = vmul.f32 %v1455_v0, %v3904_v56 }
 0x843   : > { %v1449_v14 = vsub.f32 1.5, %v1448_v4  ;;  %v1497_v12 = vperm.slane %v1495_v10, 0  ;;  %v1498_v16 = vperm.slane %v1495_v10, 2  ;;  %v1499_v20 = vperm.slane %v1495_v10, 4 }
 0x844   : > { %v1459_v18 = vadd.f32 %v1457_v6, %v3908_v61  ;;  %v3025_v6 = vld [vmem:[%s3773_s24 + $0x60] sm:$0xff] }
 0x845   : > { %v1450_v1 = vmul.f32 %v3228_v58, %v1449_v14  ;;  %v1505_v13 = vperm.slane %v1497_v12, 0  ;;  %v1506_v24 = vperm.slane %v1498_v16, 0  ;;  %v4095_v29 = vperm.slane %v1499_v20, 0  ;;  %v3038_v20 = vld [vmem:[%s3773_s24 + $0xc8] sm:$0xff] }
 0x847   : > { %v1454_v2 = vsel %vm1453_vm14, %v3228_v58, %v1450_v1  ;;  %v3026_v58 = vld [vmem:[%s3773_s24 + $0x68] sm:$0xff] }
 0x848   : > { %v1456_v5 = vmul.f32 %v1454_v2, %v4008_v63  ;;  %v1500_v63 = vperm.slane %v1495_v10, 6  ;;  %2172 = vmatpush.bf16.msra.mxu2 %v3026_v58  ;;  %v3016_v2 = vld [vmem:[%s3773_s24 + $0x18] sm:$0xff] }
 0x84a   : > { %v1458_v7 = vmul.f32 %v1456_v5, %v3904_v56  ;;  %v1508_v15 = vperm.slane %v1500_v63, 0  ;;  %v3020_v56 = vld [vmem:[%s3773_s24 + $0x38] sm:$0xff] }
 0x84b   : > { %2156 = vmatpush.bf16.msra.mxu1 %v3020_v56  ;;  %v3040_v5 = vld [vmem:[%s3773_s24 + $0xd8] sm:$0xff] }
 0x84c   : > { %v1460_v8 = vadd.f32 %v1458_v7, %v3908_v61  ;;  %2202 = vmatpush.bf16.msrb.mxu0 %v3040_v5  ;;  %v3033_v7 = vld [vmem:[%s3773_s24 + $0xa0] sm:$0xff]  ;;  %2173 = vmatpush.bf16.msra.mxu2 %v3025_v6  ;;  %v3024_v63 = vld [vmem:[%s3773_s24 + $0x58] sm:$0xff] }
 0x84d   : > { %2187 = vmatpush.bf16.msra.mxu3 %v3033_v7 }
 0x84e   : > { %v1461_v9 = vpack.c.bf16 %v1460_v8, %v1459_v18 }
 0x84f   : > { %2157 = vmatpush.bf16.msra.mxu1 %v3019_v25 }
 0x850   : > { %1677 = vmatmul.bf16.vlgmr.msrb.gmra.mxu1 %v1461_v9  ;;  %1691 = vmatmul.bf16.vlgmr.msrb.gmra.mxu2 %v1461_v9 }
 0x851   : > { %1705 = vmatmul.bf16.vlgmr.msrb.gmra.mxu3 %v1461_v9  ;;  %1719 = vmatmul.bf16.vlgmr.msra.gmra.mxu0 %v1461_v9  ;;  %v3015_v9 = vld [vmem:[%s3773_s24 + $0x10] sm:$0xff] }
 0x852   : > { %2203 = vmatpush.bf16.msrb.mxu0 %v3039_v60  ;;  %2174 = vmatpush.bf16.msra.mxu2 %v3024_v63 }
 0x853   : > { %2158 = vmatpush.bf16.msra.mxu1 %v3018_v36  ;;  %v3037_v36 = vld [vmem:[%s3773_s24 + $0xc0] sm:$0xff] }
 0x856   : > { %2204 = vmatpush.bf16.msrb.mxu0 %v3038_v20 }
 0x857   : > { %2159 = vmatpush.bf16.msra.mxu1 %v3017_v51 }
 0x85a   : > { %2205 = vmatpush.bf16.msrb.mxu0 %v3037_v36 }
 0x85b   : > { %2160 = vmatpush.bf16.msra.mxu1 %v3016_v2 }
 0x85f   : > { %2161 = vmatpush.bf16.msra.mxu1 %v3015_v9 }
 0x8cd   : > { %v1678_v19 = vpop.f32.mrf.mxu1 }
 0x8ce   : > { %v4087_v61 = vadd.f32 %v1678_v19, %v1505_v13  ;;  %v1720_v21 = vpop.f32.mrf.mxu0  ;;  %v3014_v19 = vld [vmem:[%s3773_s24 + $0x8] sm:$0xff] }
 0x8cf   : > { %v4089_v22 = vadd.f32 %v1720_v21, %v1508_v15  ;;  %2162 = vmatpush.bf16.msra.mxu1 %v3014_v19 }
 0x8d0   : > { %v2803_v23 = vmul.f32 -1.702, %v4087_v61 }
 0x8d1   : > { %v2806_v28 = vmul.f32 -1.702, %v4089_v22 }
 0x8d2   : > { %v1741_v30 = vmul.f32 1.442695, %v2803_v23 }
 0x8d3   : > { %v1747_v32 = vmul.f32 1.442695, %v2806_v28  ;;  %v1692_v33 = vpop.f32.mrf.mxu2 }
 0x8d4   : > { %3229 = vpow2.f32 %v1741_v30  ;;  %v4099_v34 = vadd.f32 %v1692_v33, %v1506_v24  ;;  %v1706_v35 = vpop.f32.mrf.mxu3  ;;  %v3023_v30 = vld [vmem:[%s3773_s24 + $0x50] sm:$0xff] }
 0x8d5   : > { %3231 = vpow2.f32 %v1747_v32  ;;  %v4104_v38 = vadd.f32 %v1706_v35, %v4095_v29  ;;  %v1680_v39 = vpop.f32.mrf.mxu1  ;;  %2175 = vmatpush.bf16.msra.mxu2 %v3023_v30  ;;  %v3013_v35 = vld [vmem:[%s3773_s24] sm:$0xff] }
 0x8d6   : > { %v2804_v40 = vmul.f32 -1.702, %v4099_v34  ;;  %v4107_v41 = vadd.f32 %v1680_v39, %v1505_v13  ;;  %v1722_v42 = vpop.f32.mrf.mxu0  ;;  %v3032_v13 = vld [vmem:[%s3773_s24 + $0x98] sm:$0xff]  ;;  %2163 = vmatpush.bf16.msra.mxu1 %v3013_v35 }
 0x8d7   : > { %v2805_v45 = vmul.f32 -1.702, %v4104_v38  ;;  %v4112_v46 = vadd.f32 %v1722_v42, %v1508_v15  ;;  %2188 = vmatpush.bf16.msra.mxu3 %v3032_v13 }
 0x8d8   : > { %v1743_v48 = vmul.f32 1.442695, %v2804_v40  ;;  %v2807_v49 = vmul.f32 -1.702, %v4107_v41 }
 0x8d9   : > { %v2810_v54 = vmul.f32 -1.702, %v4112_v46  ;;  %v1745_v0 = vmul.f32 1.442695, %v2805_v45  ;;  %2176 = vmatpush.bf16.msra.mxu2 %v3022_v43 }
 0x8da   : > { %v3230_v55 = vpop.eup %3229  ;;  %3233 = vpow2.f32 %v1743_v48  ;;  %v1749_v57 = vmul.f32 1.442695, %v2807_v49 }
 0x8db   : > { %v3232_v3 = vpop.eup %3231  ;;  %v4120_v50 = vadd.f32 1.0, %v3230_v55  ;;  %v1755_v62 = vmul.f32 1.442695, %v2810_v54  ;;  %v1694_v4 = vpop.f32.mrf.mxu2  ;;  %2189 = vmatpush.bf16.msra.mxu3 %v3031_v27 }
 0x8dc   : > { %v4122_v14 = vadd.f32 1.0, %v3232_v3  ;;  %3235 = vpow2.f32 %v1749_v57  ;;  %v4124_v1 = vadd.f32 %v1694_v4, %v1506_v24  ;;  %v1708_v28 = vpop.f32.mrf.mxu3  ;;  %v3029_v3 = vld [vmem:[%s3773_s24 + $0x80] sm:$0xff] }
 0x8dd   : > { %3237 = vrcp.f32 %v4120_v50  ;;  %v4165_v40 = vadd.f32 %v1708_v28, %v4095_v29  ;;  %v1774_v42 = vand.u32 2147483647, %v4120_v50  ;;  %v1776_v45 = vand.u32 2147483648, %v4120_v50  ;;  %2177 = vmatpush.bf16.msra.mxu2 %v3021_v47 }
 0x8de   : > { %3239 = vrcp.f32 %v4122_v14  ;;  %v2808_v18 = vmul.f32 -1.702, %v4124_v1  ;;  %v1819_v48 = vand.u32 2147483647, %v4122_v14  ;;  %v1821_v54 = vand.u32 2147483648, %v4122_v14 }
 0x8df   : > { %3241 = vpow2.f32 %v1755_v62  ;;  %v2809_v55 = vmul.f32 -1.702, %v4165_v40  ;;  %2190 = vmatpush.bf16.msra.mxu3 %v3030_v44  ;;  %vm1770_vm0 = vweird.f32 %v4120_v50  ;;  %vm4182_vm1 = vcmp.eq.f32.partialorder %v1774_v42, 8.507059e+37 }
 0x8e0   : > { %v3234_v8 = vpop.eup %3233  ;;  %3243 = vpow2.f32 %v1745_v0  ;;  %v1751_v16 = vmul.f32 1.442695, %v2808_v18  ;;  %vm1815_vm2 = vweird.f32 %v4122_v14  ;;  %v1777_v4 = vor.u32 1.1754944e-38, %v1776_v45 }
 0x8e1   : > { %v4135_v10 = vadd.f32 1.0, %v3234_v8  ;;  %vm4196_vm5 = vcmp.eq.f32.partialorder %v1819_v48, 8.507059e+37  ;;  %v1822_v8 = vor.u32 1.1754944e-38, %v1821_v54 }
 0x8e2   : > { %v3236_v12 = vpop.eup %3235 }
 0x8e3   : > { %v4139_v15 = vpop.eup %3237  ;;  %3245 = vrcp.f32 %v4135_v10  ;;  %v4150_v26 = vadd.f32 1.0, %v3236_v12  ;;  %v1753_v12 = vmul.f32 1.442695, %v2809_v55  ;;  %2191 = vmatpush.bf16.msra.mxu3 %v3029_v3  ;;  %v1791_v48 = vand.u32 2147483648, %v4135_v10 }
 0x8e4   : > { %v4142_v56 = vpop.eup %3239  ;;  %v1766_v17 = vmul.f32 %v4139_v15, %v4120_v50  ;;  %3247 = vpow2.f32 %v1751_v16  ;;  %vm1771_vm15 = vweird.f32 %v4139_v15 }
 0x8e5   : > { %v3242_v21 = vpop.eup %3241  ;;  %v1811_v23 = vmul.f32 %v4142_v56, %v4122_v14  ;;  %3249 = vrcp.f32 %v4150_v26  ;;  %vm4191_vm3 = vmor %vm1770_vm0, %vm1771_vm15  ;;  %vm1816_vm4 = vweird.f32 %v4142_v56  ;;  %vm1830_vm6 = vweird.f32 %v4150_v26 }
 0x8e6   : > { %v3244_v24 = vpop.eup %3243  ;;  %v1767_v25 = vsub.f32 1.0, %v1766_v17  ;;  %v4153_v31 = vadd.f32 1.0, %v3242_v21  ;;  %v1834_v63 = vand.u32 2147483647, %v4150_v26  ;;  %v1836_v13 = vand.u32 2147483648, %v4150_v26  ;;  %vm4220_vm7 = vmor %vm1815_vm2, %vm1816_vm4 }
 0x8e7   : > { %v1812_v33 = vsub.f32 1.0, %v1811_v23  ;;  %v4162_v39 = vadd.f32 1.0, %v3244_v24  ;;  %vm1785_vm0 = vweird.f32 %v4135_v10 }
 0x8e8   : > { %v1768_v32 = vmul.f32 %v4139_v15, %v1767_v25  ;;  %3251 = vrcp.f32 %v4153_v31  ;;  %v1879_v24 = vand.u32 2147483647, %v4153_v31  ;;  %v1881_v25 = vand.u32 2147483648, %v4153_v31 }
 0x8e9   : > { %v4160_v37 = vpop.eup %3245  ;;  %v1813_v29 = vmul.f32 %v4142_v56, %v1812_v33  ;;  %3253 = vrcp.f32 %v4162_v39  ;;  %vm1835_vm12 = vcmp.eq.f32.partialorder %v1834_v63, 8.507059e+37  ;;  %vm1875_vm13 = vweird.f32 %v4153_v31 }
 0x8ea   : > { %v1769_v49 = vadd.f32 %v4139_v15, %v1768_v32  ;;  %v1781_v51 = vmul.f32 %v4160_v37, %v4135_v10  ;;  %v3248_v52 = vpop.eup %3247  ;;  %vm1786_vm10 = vweird.f32 %v4160_v37  ;;  %v1882_v44 = vor.u32 1.1754944e-38, %v1881_v25 }
 0x8eb   : > { %v3250_v57 = vpop.eup %3249  ;;  %v1814_v6 = vadd.f32 %v4142_v56, %v1813_v29  ;;  %v4205_v18 = vadd.f32 1.0, %v3248_v52  ;;  %vm1880_vm15 = vcmp.eq.f32.partialorder %v1879_v24, 8.507059e+37  ;;  %v1804_v63 = vand.u32 2147483647, %v4162_v39 }
 0x8ec   : > { %v1826_v50 = vmul.f32 %v3250_v57, %v4150_v26  ;;  %v1773_v5 = vsel %vm4191_vm3, %v4139_v15, %v1769_v49  ;;  %v1782_v7 = vsub.f32 1.0, %v1781_v51  ;;  %vm1831_vm8 = vweird.f32 %v3250_v57 }
 0x8ed   : > { %3255 = vrcp.f32 %v4205_v18  ;;  %v1778_v16 = vsel %vm4182_vm1, %v1777_v4, %v1773_v5  ;;  %v1818_v21 = vsel %vm4220_vm7, %v4142_v56, %v1814_v6  ;;  %vm1832_vm11 = vmor %vm1830_vm6, %vm1831_vm8  ;;  %v1837_v56 = vor.u32 1.1754944e-38, %v1836_v13 }
 0x8ee   : > { %v3252_v2 = vpop.eup %3251  ;;  %v1827_v9 = vsub.f32 1.0, %v1826_v50  ;;  %v1783_v23 = vmul.f32 %v4160_v37, %v1782_v7  ;;  %3257 = vpow2.f32 %v1753_v12  ;;  %v1885_v27 = vmul.f32 %v1778_v16, %v4087_v61  ;;  %vm4249_vm1 = vmor %vm1785_vm0, %vm1786_vm10 }
 0x8ef   : > { %v1871_v60 = vmul.f32 %v3252_v2, %v4153_v31  ;;  %v4212_v15 = vpop.eup %3253  ;;  %vm1876_vm9 = vweird.f32 %v3252_v2  ;;  %v1823_v36 = vsel %vm4196_vm5, %v1822_v8, %v1818_v21  ;;  %v1789_v31 = vand.u32 2147483647, %v4135_v10 }
 0x8f0   : > { %v1828_v19 = vmul.f32 %v3250_v57, %v1827_v9  ;;  %v1796_v14 = vmul.f32 %v4212_v15, %v4162_v39  ;;  %v1784_v42 = vadd.f32 %v4160_v37, %v1783_v23  ;;  %vm1877_vm14 = vmor %vm1875_vm13, %vm1876_vm9  ;;  %v1888_v51 = vmul.f32 %v1823_v36, %v4089_v22 }
 0x8f1   : > { %v1872_v20 = vsub.f32 1.0, %v1871_v60  ;;  %v1851_v10 = vand.u32 2147483648, %v4205_v18  ;;  %v1849_v62 = vand.u32 2147483647, %v4205_v18  ;;  %v1792_v4 = vor.u32 1.1754944e-38, %v1791_v48 }
 0x8f2   : > { %v1829_v28 = vadd.f32 %v3250_v57, %v1828_v19  ;;  %v1797_v58 = vsub.f32 1.0, %v1796_v14  ;;  %vm1790_vm3 = vcmp.eq.f32.partialorder %v1789_v31, 8.507059e+37  ;;  %vm1845_vm4 = vweird.f32 %v4205_v18 }
 0x8f3   : > { %v1873_v30 = vmul.f32 %v3252_v2, %v1872_v20  ;;  %v3256_v35 = vpop.eup %3255  ;;  %vm1850_vm6 = vcmp.eq.f32.partialorder %v1849_v62, 8.507059e+37  ;;  %vm1801_vm7 = vweird.f32 %v4212_v15  ;;  %v1806_v12 = vand.u32 2147483648, %v4162_v39 }
 0x8f4   : > { %v1833_v32 = vsel %vm1832_vm11, %v3250_v57, %v1829_v28  ;;  %v1841_v61 = vmul.f32 %v3256_v35, %v4205_v18  ;;  %v3258_v29 = vpop.eup %3257  ;;  %v1788_v57 = vsel %vm4249_vm1, %v4160_v37, %v1784_v42  ;;  %vm1846_vm2 = vweird.f32 %v3256_v35 }
 0x8f5   : > { %v1874_v33 = vadd.f32 %v3252_v2, %v1873_v30  ;;  %v1838_v43 = vsel %vm1835_vm12, %v1837_v56, %v1833_v32  ;;  %v1763_v47 = vadd.f32 1.0, %v3258_v29  ;;  %vm1847_vm5 = vmor %vm1845_vm4, %vm1846_vm2  ;;  %v1852_v37 = vor.u32 1.1754944e-38, %v1851_v10 }
 0x8f6   : > { %v1889_v26 = vmul.f32 %v1838_v43, %v4107_v41  ;;  %v1842_v55 = vsub.f32 1.0, %v1841_v61  ;;  %v1798_v50 = vmul.f32 %v4212_v15, %v1797_v58  ;;  %vm1800_vm8 = vweird.f32 %v4162_v39 }
 0x8f7   : > { %v1878_v45 = vsel %vm1877_vm14, %v3252_v2, %v1874_v33  ;;  %3259 = vrcp.f32 %v1763_v47  ;;  %vm1802_vm9 = vmor %vm1800_vm8, %vm1801_vm7  ;;  %v1866_v16 = vand.u32 2147483648, %v1763_v47  ;;  %v1864_v17 = vand.u32 2147483647, %v1763_v47 }
 0x8f8   : > { %v1883_v49 = vsel %vm1880_vm15, %v1882_v44, %v1878_v45  ;;  %v1893_v41 = vpack.c.bf16 %v1889_v26, %v1885_v27  ;;  %v1843_v22 = vmul.f32 %v3256_v35, %v1842_v55  ;;  %v1799_v9 = vadd.f32 %v4212_v15, %v1798_v50 }
 0x8f9   : > { %v1892_v54 = vmul.f32 %v1883_v49, %v4112_v46  ;;  %v1793_v46 = vsel %vm1790_vm3, %v1792_v4, %v1788_v57  ;;  %v1807_v19 = vor.u32 1.1754944e-38, %v1806_v12  ;;  %vm1805_vm11 = vcmp.eq.f32.partialorder %v1804_v63, 8.507059e+37 }
 0x8fa   : > { %2164 = vmatmul.bf16.vlgmr.msra.gmra.mxu1 %v1893_v41  ;;  %v1844_v0 = vadd.f32 %v3256_v35, %v1843_v22  ;;  %v1886_v6 = vmul.f32 %v1793_v46, %v4099_v34  ;;  %v1803_v34 = vsel %vm1802_vm9, %v4212_v15, %v1799_v9  ;;  %vm1860_vm12 = vweird.f32 %v1763_v47  ;;  %v1961_v15 = vld [vmem:[%s705_s1] sm:$0x1] }
 0x8fb   : > { %v1896_v3 = vpack.c.bf16 %v1892_v54, %v1888_v51  ;;  %v1808_v21 = vsel %vm1805_vm11, %v1807_v19, %v1803_v34  ;;  %v1867_v23 = vor.u32 1.1754944e-38, %v1866_v16  ;;  %vm1865_vm14 = vcmp.eq.f32.partialorder %v1864_v17, 8.507059e+37 }
 0x8fc   : > { %v1848_v2 = vsel %vm1847_vm5, %v3256_v35, %v1844_v0  ;;  %v1887_v25 = vmul.f32 %v1808_v21, %v4104_v38  ;;  %v1962_v14 = vunpack.c.l.bf16 %v1961_v15 }
 0x8fd   : > { %2206 = vmatmul.bf16.vlgmr.msrb.gmra.mxu0 %v1896_v3  ;;  %v1853_v5 = vsel %vm1850_vm6, %v1852_v37, %v1848_v2  ;;  %v3260_v8 = vpop.eup %3259 }
 0x8fe   : > { %v1890_v7 = vmul.f32 %v1853_v5, %v4124_v1  ;;  %v1856_v18 = vmul.f32 %v3260_v8, %v1763_v47  ;;  %vm1861_vm10 = vweird.f32 %v3260_v8  ;;  %v1963_v27 = vperm.slane %v1962_v14, 0 }
 0x8ff   : > { %vm1862_vm13 = vmor %vm1860_vm12, %vm1861_vm10 }
 0x900   : > { %v1894_v60 = vpack.c.bf16 %v1890_v7, %v1886_v6  ;;  %v1857_v13 = vsub.f32 1.0, %v1856_v18 }
 0x902   : > { %2178 = vmatmul.bf16.vlgmr.msra.gmra.mxu2 %v1894_v60  ;;  %v1858_v1 = vmul.f32 %v3260_v8, %v1857_v13 }
 0x904   : > { %v1859_v20 = vadd.f32 %v3260_v8, %v1858_v1 }
 0x906   : > { %v1863_v24 = vsel %vm1862_vm13, %v3260_v8, %v1859_v20 }
 0x907   : > { %v1868_v39 = vsel %vm1865_vm14, %v1867_v23, %v1863_v24 }
 0x908   : > { %v1891_v28 = vmul.f32 %v1868_v39, %v4165_v40 }
 0x90a   : > { %v1895_v30 = vpack.c.bf16 %v1891_v28, %v1887_v25 }
 0x90c   : > { %2192 = vmatmul.bf16.vlgmr.msra.gmra.mxu3 %v1895_v30 }
 0x977   : > { %v2165_v56 = vpop.f32.mrf.mxu1 }
 0x978   : > { %v2166_v33 = vadd.f32 %v2165_v56, %v1963_v27 }
 0x97a   : > { %v2207_v36 = vpop.f32.mrf.mxu0 }
 0x97f   : > { %v2167_v42 = vpop.f32.mrf.mxu1 }
 0x980   : > { %v2168_v26 = vadd.f32 %v2167_v42, %v1963_v27 }
 0x982   : > { %v2209_v49 = vpop.f32.mrf.mxu0 }
 0x985   : > { %v2179_v32 = vpop.f32.mrf.mxu2 }
 0x986   : > { %v2180_v35 = vadd.f32 %v2179_v32, %v2166_v33 }
 0x98d   : > { %v2181_v38 = vpop.f32.mrf.mxu2 }
 0x98e   : > { %v2182_v61 = vadd.f32 %v2181_v38, %v2168_v26 }
 0x98f   : > { %v2193_v43 = vpop.f32.mrf.mxu3 }
 0x990   : > { %v2194_v44 = vadd.f32 %v2193_v43, %v2180_v35 }
 0x992   : > { %v2208_v40 = vadd.f32 %v2207_v36, %v2194_v44 }
 0x994   : > { %v2212_v45 = vadd.f32 %v2208_v40, %v3992_v53 }
 0x996   : > { %2214 = vst [vmem:[#allocation2] sm:$0xff] %v2212_v45 }
 0x997   : > { %v2195_v31 = vpop.f32.mrf.mxu3 }
 0x998   : > { %v2196_v48 = vadd.f32 %v2195_v31, %v2182_v61 }
 0x99a   : > { %v2210_v29 = vadd.f32 %v2209_v49, %v2196_v48  ;;  %2219 = sbr.rel (%p2939_p10) target bundleno = 2740 (0xab4), region = 96 }
 0x99c   : > { %v2213_v51 = vadd.f32 %v2210_v29, %v3997_v59 }
 0x99e   : > { %2215 = vst [vmem:[#allocation2 + $0x8] sm:$0xff] %v2213_v51 }
 0x99f   : > { %2224 = vadd.xlane.f32.xlu0 %v2212_v45  ;;  %v2220_v6 = vld [vmem:[%s4439_s4] sm:$0x1] }
 0x9a0   : > { %v2221_v60 = vunpack.c.l.bf16 %v2220_v6 }
 0x9a2   : > { %v2264_v34 = vperm.slane %v2221_v60, 0 }
 0x9a7   : > { %2226 = vadd.xlane.f32.xlu0 %v2213_v51 }
 0xa12   : > { %v2225_v52 = vpop.xlane.xlu0 %2224 }
 0xa13   : > { %v2228_v41 = vmul.f32 %v2225_v52, %v3829_v11 }
 0xa15   : > { %v2230_v54 = vsub.f32 %v2212_v45, %v2228_v41 }
 0xa17   : > { %v2232_v55 = vmul.f32 %v2230_v54, %v2230_v54 }
 0xa19   : > { %2234 = vadd.xlane.f32.xlu1 %v2232_v55 }
 0xa1a   : > { %v2227_v53 = vpop.xlane.xlu0 %2226 }
 0xa1b   : > { %v2229_v57 = vmul.f32 %v2227_v53, %v3829_v11 }
 0xa1d   : > { %v2231_v58 = vsub.f32 %v2213_v51, %v2229_v57 }
 0xa1f   : > { %v2233_v10 = vmul.f32 %v2231_v58, %v2231_v58 }
 0xa21   : > { %2236 = vadd.xlane.f32.xlu1 %v2233_v10 }
 0xa8c   : > { %v2235_v47 = vpop.xlane.xlu1 %2234 }
 0xa8d   : > { %v2238_v59 = vmul.f32 %v2235_v47, %v3829_v11 }
 0xa8f   : > { %v2240_v3 = vadd.f32 1e-05, %v2238_v59 }
 0xa91   : > { %3261 = vrsqrt.f32 %v2240_v3  ;;  %vm2248_vm0 = vweird.f32 %v2240_v3 }
 0xa94   : > { %v2237_v22 = vpop.xlane.xlu1 %2236 }
 0xa95   : > { %v2239_v62 = vmul.f32 %v2237_v22, %v3829_v11  ;;  %v2222_v11 = vld [vmem:[%s4440_s5] sm:$0x1] }
 0xa96   : > { %v2223_v13 = vunpack.c.l.bf16 %v2222_v11 }
 0xa97   : > { %v3262_v4 = vpop.eup %3261  ;;  %v2241_v0 = vadd.f32 1e-05, %v2239_v62 }
 0xa98   : > { %v2243_v46 = vmul.f32 %v3262_v4, %v2240_v3  ;;  %vm2249_vm15 = vweird.f32 %v3262_v4  ;;  %v2267_v20 = vperm.slane %v2223_v13, 0 }
 0xa99   : > { %3263 = vrsqrt.f32 %v2241_v0  ;;  %vm2250_vm1 = vmor %vm2248_vm0, %vm2249_vm15  ;;  %vm2258_vm3 = vweird.f32 %v2241_v0 }
 0xa9a   : > { %v2244_v37 = vmul.f32 %v3262_v4, %v2243_v46 }
 0xa9c   : > { %v2245_v50 = vmul.f32 0.5, %v2244_v37 }
 0xa9e   : > { %v2246_v2 = vsub.f32 1.5, %v2245_v50 }
 0xa9f   : > { %v3264_v5 = vpop.eup %3263 }
 0xaa0   : > { %v2247_v7 = vmul.f32 %v3262_v4, %v2246_v2  ;;  %v2253_v8 = vmul.f32 %v3264_v5, %v2241_v0  ;;  %vm2259_vm2 = vweird.f32 %v3264_v5 }
 0xaa1   : > { %vm2260_vm4 = vmor %vm2258_vm3, %vm2259_vm2 }
 0xaa2   : > { %v2254_v9 = vmul.f32 %v3264_v5, %v2253_v8  ;;  %v2251_v18 = vsel %vm2250_vm1, %v3262_v4, %v2247_v7 }
 0xaa3   : > { %v2262_v16 = vmul.f32 %v2251_v18, %v2230_v54 }
 0xaa4   : > { %v2255_v12 = vmul.f32 0.5, %v2254_v9 }
 0xaa5   : > { %v2265_v19 = vmul.f32 %v2264_v34, %v2262_v16 }
 0xaa6   : > { %v2256_v63 = vsub.f32 1.5, %v2255_v12 }
 0xaa7   : > { %v2268_v24 = vadd.f32 %v2267_v20, %v2265_v19 }
 0xaa8   : > { %v2257_v1 = vmul.f32 %v3264_v5, %v2256_v63 }
 0xaaa   : > { %v2261_v17 = vsel %vm2260_vm4, %v3264_v5, %v2257_v1 }
 0xaab   : > { %v2263_v21 = vmul.f32 %v2261_v17, %v2231_v58 }
 0xaad   : > { %v2266_v23 = vmul.f32 %v2264_v34, %v2263_v21 }
 0xaaf   : > { %v2269_v39 = vadd.f32 %v2267_v20, %v2266_v23 }
 0xab1   : > { %v3053_v25 = vpack.c.bf16 %v2269_v39, %v2268_v24 }
 0xab3   : > { %3054 = vst [vmem:[%s680_s18] sm:$0xff] %v3053_v25  }
 0xab4 PF: > { %s4441_s8 = sld [smem:[#allocation17_spill]]  ;;  %s3045_s6 = sshll.u32 %s3503_s15, 3 }
 0xab5   : > { %s4443_s1 = sld [smem:[#allocation42_spill]]  ;;  %s2287_s29 = sshll.u32 %s680_s18, 4  ;;  %s2288_s29 = int_to_ptr.vmem [resolvable:$true] %s2287_s29 }
 0xaba   : > { %s4444_s3 = sand.u32 1, %s4441_s8  }
 0xabb   : > { %s2286_s9 = scalar_lea.hbm %s4443_s1, %s3045_s6  ;;  %s2275_s19 = scalar_lea.sflag [#allocation5], %s4444_s3 }
 0xabc   : > { %s2289_s16 = sshll.u32 %s2286_s9, 4  ;;  %s3405_s10 = scalar_lea.hbm %s4443_s1, 16  ;;  %s2290_s16 = int_to_ptr.hbm [resolvable:$true] %s2289_s16 }
 0xabd   : > { %s3399_s12 = sshra.s32 %s2290_s16, 4  ;;  %s3400_s12 = int_to_ptr.hbm [resolvable:$true] %s3399_s12 }
 0xabe   : > { %s3401_s13 = scalar_lea.hbm %s3400_s12, 8  ;;  %p3406_p1 = scmp.lt.s32.totalorder %s3400_s12, %s4443_s1 }
 0xabf   : > { %p3402_p11 = scmp.ne.s32.totalorder %s3400_s12, %s3401_s13  ;;  %p3407_p4 = scmp.lt.s32.totalorder %s3405_s10, %s3401_s13 }
 0xac1   : > { %p3403_p13 = pnand %p3402_p11, %p3690_p12  ;;  %p3408_p5 = por %p3407_p4, %p3406_p1 }
 0xac3   : > { %p3404_p0 = pneg %p3403_p13 }
 0xac5   : > { %p3409_p3 = pnand %p3408_p5, %p3404_p0 }
 0xac7   : > { %3412 = shalt.err (!%p3409_p3)
}
 0xac8   : > { %s3527_s11 = smov 4  }
 0xac9   : > { %3067 = dma.vmem_to_hbm [thread:$0]  (%p3690_p12), %s2288_s29, 128, %s2290_s16, %s2275_s19, %s3525_s26, %s3525_s26, %s3527_s11  }
 0xaca PF: > { %s4445_s18 = sld [smem:[#allocation23_spill]] }
 0xacb   : > { %s4446_s7 = sld [smem:[#allocation16_spill]] }
 0xad0   : > { %p3087_p6 = scmp.ge.s32.totalorder %s4445_s18, 2 }
 0xad1   : > { %s2304_s30 = sand.u32 1, %s4446_s7  }
 0xad2   : > { %p3083_p7 = pnand %p3087_p6, %p3700_p2  ;;  %s2305_s14 = scalar_lea.sflag [#allocation5], %s2304_s30 }
 0xad4   : > { %p3084_p9 = pneg %p3083_p7 }
 0xad6   : > { %3470 = dma.done.wait (%p3084_p9), %s2305_s14, 128  }
 0xad7   : > { %3472 = vsyncadd (%p3084_p9), %s2305_s14, 4294967168  ;;  %s35_s18 = sadd.s32 1, %s4445_s18   ;;  %s4448_s25 = sld [smem:[#allocation17_spill]] }
 0xad8   : > { %p32_p8 = scmp.ge.s32.totalorder %s35_s18, 8   ;;  %s4449_s26 = sld [smem:[#allocation18_spill]] }
 0xad9   : > { %s4450_s27 = sld [smem:[#allocation27_spill]] }
 0xada   : > { %s4451_s28 = sld [smem:[#allocation19_spill]] }
 0xadb   : > { %s4452_s29 = sld [smem:[#allocation20_spill]] }
 0xadc   : > { %s4453_s30 = sld [smem:[#allocation26_spill]]  ;;  %34 = sbr.rel (!%p32_p8) target bundleno = 27 (0x1b), region = 183 }
 0xadd   : > { %s4454_s14 = sld [smem:[#allocation21_spill]] }
 0xade   : > { %s4455_s15 = sld [smem:[#allocation22_spill]] }
 0xadf   : > { %s4456_s16 = sld [smem:[#allocation24_spill]] }
 0xae0   : > { %s4457_s17 = sld [smem:[#allocation25_spill]] }
 0xae1   :  { %2311 = vsyncpa [#allocation4], 1 }
 0xae2   :  { %2313 = vsyncpa [#allocation4 + $0x1], 1 }
 0xae3   :  { %2314 = vsyncpa [#allocation7], 1 }
 0xae4   :  { %2316 = vsyncpa [#allocation7 + $0x1], 1 }
 0xae5   :  { %2317 = vsyncpa [#allocation10], 1 }
 0xae6   :  { %2319 = vsyncpa [#allocation10 + $0x1], 1 }
 0xae7   :  { %2320 = vsyncpa [#allocation5], 1 }
 0xae8   :  { %2322 = vsyncpa [#allocation5 + $0x1], 1 }

</bundles_post_ra>
